<compile_context>
chip_gen: v7x
topology: tpu7x:2x2x1
jax: 0.10.0
libtpu: 0.0.40
codegen_flags: <defaults>
</compile_context>

<pallas_src>
import functools

import jax
import jax.numpy as jnp
from jax.experimental import pallas as pl
from jax.experimental.pallas import tpu as pltpu


def _rcab_kernel(x_ref, w1_ref, b1_ref, w2_ref, b2_ref,
                 w3_ref, b3_ref, w4_ref, b4_ref, o_ref,
                 pad_ref, taps_ref, *, H, W, HW, HWp, PAD):
    f32 = jnp.float32
    bf16 = jnp.bfloat16
    C = x_ref.shape[0]
    inv_hw = 1.0 / float(HW)

    # Static lane-index masks shared by both convs.
    pos = jax.lax.broadcasted_iota(jnp.int32, (1, HWp), 1)
    col = pos % W
    col_ok = {0: col >= 1, 2: col <= (W - 2)}            # kx = 0 / 2
    tail_ok = (pos < HW) if HWp != HW else None          # lane-padding mask

    # Zero only the two halo strips; the interior is fully overwritten before
    # every use, so the strips supply the conv zero padding.
    zero_strip = jnp.zeros((C, PAD), bf16)
    pad_ref[:, 0:PAD] = zero_strip
    pad_ref[:, PAD + HWp:2 * PAD + HWp] = zero_strip

    def conv3x3(h_bf16, w_ref, b_ref):
        # h_bf16: (C, HWp) bf16 -> conv3x3(h) + bias as (C, HWp) f32.
        pad_ref[:, PAD:PAD + HWp] = h_bf16
        # Stack the 9 shifted (and border-masked) taps into (9C, HWp), then a
        # single deep bf16 MXU contraction with an f32 accumulator.
        for ky in range(3):
            for kx in range(3):
                t = 3 * ky + kx
                s = (ky - 1) * W + (kx - 1)
                tap = pad_ref[:, PAD + s:PAD + s + HWp]
                if kx != 1:
                    tap = jnp.where(col_ok[kx], tap, 0.0).astype(bf16)
                taps_ref[t * C:(t + 1) * C, :] = tap
        out = jnp.dot(w_ref[...], taps_ref[...], preferred_element_type=f32)
        return out + b_ref[...]

    x32 = x_ref[...].astype(f32)                          # (C, HWp)

    # body: conv -> ReLU -> conv
    h1 = jnp.maximum(conv3x3(x_ref[...].astype(bf16), w1_ref, b1_ref), 0.0)
    if tail_ok is not None:
        h1 = jnp.where(tail_ok, h1, 0.0)
    h2 = conv3x3(h1.astype(bf16), w2_ref, b2_ref)
    if tail_ok is not None:
        h2 = jnp.where(tail_ok, h2, 0.0)

    # CALayer (squeeze/excite): VPU/XLU broadcast-multiply + reduce, f32.
    pooled = jnp.sum(h2, axis=-1, keepdims=True) * inv_hw          # (C, 1)
    mid = jnp.sum(pooled * w3_ref[...], axis=0, keepdims=True)     # (1, Cr)
    mid = jnp.maximum(mid + b3_ref[...], 0.0)
    att = jnp.sum(mid * w4_ref[...], axis=-1, keepdims=True)       # (C, 1)
    att = jax.nn.sigmoid(att + b4_ref[...])

    # channel scaling + residual
    o_ref[...] = (h2 * att + x32).astype(o_ref.dtype)


def rcab(x, w1, b1, w2, b2, w3, b3, w4, b4, *, vmem_limit_bytes=None):
    """RCAB forward.

    x:  (N, C, H, W)                     w1, w2: (C, C, 3, 3) conv weights
    b1, b2: (C,) conv biases             w3: (C//r, C), b3: (C//r,)  SE conv 1
    w4: (C, C//r), b4: (C,)              SE conv 2
    """
    N, C, H, W = x.shape
    HW = H * W
    Cr = w3.shape[0]
    LANES = 128
    HWp = ((HW + LANES - 1) // LANES) * LANES        # lane-dense spatial axis
    PAD = ((W + 1 + LANES - 1) // LANES) * LANES     # aligned zero halo
    assert PAD >= W + 1

    x_flat = x.reshape(N, C, HW)
    if HWp != HW:
        x_flat = jnp.pad(x_flat, ((0, 0), (0, 0), (0, HWp - HW)))

    bf16 = jnp.bfloat16
    # (Cout, Cin, ky, kx) -> (Cout, 9*Cin) with tap index t = 3*ky + kx major,
    # Cin minor — matches the in-kernel (9C, HWp) tap stack.  bf16 for MXU.
    w1_f = jnp.transpose(w1, (0, 2, 3, 1)).reshape(C, 9 * C).astype(bf16)
    w2_f = jnp.transpose(w2, (0, 2, 3, 1)).reshape(C, 9 * C).astype(bf16)
    b1_c = b1.reshape(C, 1).astype(jnp.float32)
    b2_c = b2.reshape(C, 1).astype(jnp.float32)
    w3_t = jnp.transpose(w3).astype(jnp.float32)          # (C, Cr)
    b3_r = b3.reshape(1, Cr).astype(jnp.float32)
    w4_k = w4.astype(jnp.float32)                         # (C, Cr)
    b4_c = b4.reshape(C, 1).astype(jnp.float32)

    kernel = functools.partial(_rcab_kernel, H=H, W=W, HW=HW, HWp=HWp, PAD=PAD)

    compiler_kwargs = dict(dimension_semantics=("parallel",))
    if vmem_limit_bytes is not None:     # raise for bigger spatial tiles
        compiler_kwargs["vmem_limit_bytes"] = vmem_limit_bytes

    itemsize = jnp.dtype(x.dtype).itemsize
    weight_bytes = ((w1_f.size + w2_f.size) * 2
                    + (w3_t.size + w4_k.size + b1_c.size + b2_c.size
                       + b3_r.size + b4_c.size) * 4)
    cost = pl.CostEstimate(
        flops=2 * 2 * 9 * C * C * HW * N,
        transcendentals=N * C,
        bytes_accessed=2 * N * C * HWp * itemsize + weight_bytes)

    out_flat = pl.pallas_call(
        kernel,
        out_shape=jax.ShapeDtypeStruct((N, C, HWp), x.dtype),
        grid_spec=pltpu.PrefetchScalarGridSpec(
            num_scalar_prefetch=0,
            grid=(N,),
            in_specs=[
                pl.BlockSpec((None, C, HWp), lambda n: (n, 0, 0)),   # x
                pl.BlockSpec((C, 9 * C), lambda n: (0, 0)),          # conv1 w
                pl.BlockSpec((C, 1), lambda n: (0, 0)),              # conv1 b
                pl.BlockSpec((C, 9 * C), lambda n: (0, 0)),          # conv2 w
                pl.BlockSpec((C, 1), lambda n: (0, 0)),              # conv2 b
                pl.BlockSpec((C, Cr), lambda n: (0, 0)),             # SE w1^T
                pl.BlockSpec((1, Cr), lambda n: (0, 0)),             # SE b1
                pl.BlockSpec((C, Cr), lambda n: (0, 0)),             # SE w2
                pl.BlockSpec((C, 1), lambda n: (0, 0)),              # SE b2
            ],
            out_specs=pl.BlockSpec((None, C, HWp), lambda n: (n, 0, 0)),
            scratch_shapes=[
                pltpu.VMEM((C, HWp + 2 * PAD), jnp.bfloat16),  # haloed act
                pltpu.VMEM((9 * C, HWp), jnp.bfloat16),        # stacked taps
            ]),
        compiler_params=pltpu.CompilerParams(**compiler_kwargs),
        cost_estimate=cost,
    )(x_flat, w1_f, b1_c, w2_f, b2_c, w3_t, b3_r, w4_k, b4_c)

    if HWp != HW:
        out_flat = out_flat[:, :, :HW]
    return out_flat.reshape(N, C, H, W)


def rcab_ref(x, w1, b1, w2, b2, w3, b3, w4, b4):
    """Pure-JAX reference matching the PyTorch RCAB forward (bn=False,
    act=ReLU, res_scale=1, default_conv with padding=ksize//2)."""
    hi = jax.lax.Precision.HIGHEST

    def conv3x3(h, w, b):
        out = jax.lax.conv_general_dilated(
            h, w, window_strides=(1, 1), padding=((1, 1), (1, 1)),
            dimension_numbers=("NCHW", "OIHW", "NCHW"), precision=hi)
        return out + b[None, :, None, None]

    h1 = jnp.maximum(conv3x3(x, w1, b1), 0.0)
    h2 = conv3x3(h1, w2, b2)
    pooled = jnp.mean(h2, axis=(2, 3))                               # (N, C)
    mid = jnp.maximum(jnp.dot(pooled, w3.T, precision=hi) + b3, 0.0)
    att = jax.nn.sigmoid(jnp.dot(mid, w4.T, precision=hi) + b4)
    return h2 * att[:, :, None, None] + x


if __name__ == "__main__":
    # Small shapes consistent with the module: n_feat=32, ksize=3, reduction=16.
    N, C, H, W = 2, 32, 16, 16
    reduction = 16
    Cr = C // reduction

    key = jax.random.PRNGKey(0)
    ks = jax.random.split(key, 9)
    x = jax.random.normal(ks[0], (N, C, H, W), dtype=jnp.float32)
    w1 = jax.random.normal(ks[1], (C, C, 3, 3), dtype=jnp.float32) * 0.05
    b1 = jax.random.normal(ks[2], (C,), dtype=jnp.float32) * 0.05
    w2 = jax.random.normal(ks[3], (C, C, 3, 3), dtype=jnp.float32) * 0.05
    b2 = jax.random.normal(ks[4], (C,), dtype=jnp.float32) * 0.05
    w3 = jax.random.normal(ks[5], (Cr, C), dtype=jnp.float32) * 0.1   # SE 1x1 conv 1
    b3 = jax.random.normal(ks[6], (Cr,), dtype=jnp.float32) * 0.1
    w4 = jax.random.normal(ks[7], (C, Cr), dtype=jnp.float32) * 0.1   # SE 1x1 conv 2
    b4 = jax.random.normal(ks[8], (C,), dtype=jnp.float32) * 0.1

    out = rcab(x, w1, b1, w2, b2, w3, b3, w4, b4)
    out = jax.block_until_ready(out)

    ref = rcab_ref(x, w1, b1, w2, b2, w3, b3, w4, b4)
    assert out.shape == (N, C, H, W)
    # Tolerance is loosened vs the old HIGHEST-precision kernel: the conv
    # matmuls now feed bf16 to the MXU (f32 accumulation), as recommended.
    err = float(jnp.max(jnp.abs(out - ref)))
    assert jnp.allclose(out, ref, atol=8e-2, rtol=3e-2), (
        f"mismatch vs reference, max abs err = {err}")

    print("KERNEL_OK")
</pallas_src>

<mosaic_0001>
module attributes {stable_mosaic.version = 11 : i64} {
  func.func @_rcab_kernel(%arg0: i32, %arg1: memref<1x32x256xf32, #tpu.memory_space<vmem>>, %arg2: memref<32x288xbf16, #tpu.memory_space<vmem>>, %arg3: memref<32x1xf32, #tpu.memory_space<vmem>>, %arg4: memref<32x288xbf16, #tpu.memory_space<vmem>>, %arg5: memref<32x1xf32, #tpu.memory_space<vmem>>, %arg6: memref<32x2xf32, #tpu.memory_space<vmem>>, %arg7: memref<1x2xf32, #tpu.memory_space<vmem>>, %arg8: memref<32x2xf32, #tpu.memory_space<vmem>>, %arg9: memref<32x1xf32, #tpu.memory_space<vmem>>, %arg10: memref<1x32x256xf32, #tpu.memory_space<vmem>>, %arg11: memref<32x512xbf16, #tpu.memory_space<vmem>>, %arg12: memref<288x256xbf16, #tpu.memory_space<vmem>>) attributes {dimension_semantics = [#tpu.dimension_semantics<parallel>], iteration_bounds = array<i64: 2>, scalar_prefetch = 0 : i64, scratch_operands = 2 : i64, tpu.core_type = #tpu.core_type<tc>, window_params = [{transform_indices = @transform_0, window_bounds = array<i64: 1, 32, 256>}, {pipeline_mode = #tpu.pipeline_mode<synchronous>, transform_indices = @transform_1, window_bounds = array<i64: 32, 288>}, {pipeline_mode = #tpu.pipeline_mode<synchronous>, transform_indices = @transform_2, window_bounds = array<i64: 32, 1>}, {pipeline_mode = #tpu.pipeline_mode<synchronous>, transform_indices = @transform_3, window_bounds = array<i64: 32, 288>}, {pipeline_mode = #tpu.pipeline_mode<synchronous>, transform_indices = @transform_4, window_bounds = array<i64: 32, 1>}, {pipeline_mode = #tpu.pipeline_mode<synchronous>, transform_indices = @transform_5, window_bounds = array<i64: 32, 2>}, {pipeline_mode = #tpu.pipeline_mode<synchronous>, transform_indices = @transform_6, window_bounds = array<i64: 1, 2>}, {pipeline_mode = #tpu.pipeline_mode<synchronous>, transform_indices = @transform_7, window_bounds = array<i64: 32, 2>}, {pipeline_mode = #tpu.pipeline_mode<synchronous>, transform_indices = @transform_8, window_bounds = array<i64: 32, 1>}, {transform_indices = @transform_9, window_bounds = array<i64: 1, 32, 256>}]} {
    %0 = tpu.iota {dimensions = array<i32: 1>} : vector<1x256xi32>
    %c16_i32 = arith.constant 16 : i32
    %c0_i32 = arith.constant 0 : i32
    %1 = arith.cmpi eq, %c16_i32, %c0_i32 : i32
    %c1_i32 = arith.constant 1 : i32
    %2 = arith.select %1, %c1_i32, %c16_i32 : i32
    %3 = vector.broadcast %2 : i32 to vector<1x256xi32>
    %4 = arith.remsi %0, %3 : vector<1x256xi32>
    %c0_i32_0 = arith.constant 0 : i32
    %5 = vector.broadcast %c0_i32_0 : i32 to vector<1x256xi32>
    %6 = arith.cmpi ne, %4, %5 : vector<1x256xi32>
    %c0_i32_1 = arith.constant 0 : i32
    %7 = vector.broadcast %c0_i32_1 : i32 to vector<1x256xi32>
    %8 = arith.cmpi slt, %4, %7 : vector<1x256xi32>
    %c0_i32_2 = arith.constant 0 : i32
    %9 = arith.cmpi slt, %2, %c0_i32_2 : i32
    %10 = vector.broadcast %9 : i1 to vector<1x256xi1>
    %11 = vector.broadcast %10 : vector<1x256xi1> to vector<1x256xi1>
    %12 = arith.xori %8, %11 : vector<1x256xi1>
    %13 = arith.andi %12, %6 : vector<1x256xi1>
    %14 = vector.broadcast %2 : i32 to vector<1x256xi32>
    %15 = arith.addi %4, %14 : vector<1x256xi32>
    %16 = arith.select %13, %15, %4 : vector<1x256xi1>, vector<1x256xi32>
    %c1_i32_3 = arith.constant 1 : i32
    %17 = vector.broadcast %c1_i32_3 : i32 to vector<1x256xi32>
    %18 = arith.cmpi sge, %16, %17 : vector<1x256xi32>
    %c14_i32 = arith.constant 14 : i32
    %19 = vector.broadcast %c14_i32 : i32 to vector<1x256xi32>
    %20 = arith.cmpi sle, %16, %19 : vector<1x256xi32>
    %cst = arith.constant 0.000000e+00 : bf16
    %21 = vector.broadcast %cst : bf16 to vector<32x128xbf16>
    %c0 = arith.constant 0 : index
    %c0_4 = arith.constant 0 : index
    %22 = vector.load %arg11[%c0, %c0_4] : memref<32x512xbf16, #tpu.memory_space<vmem>>, vector<32x128xbf16>
    tpu.vector_store %arg11[%c0, %c0_4], %21 {strides = array<i32>} : memref<32x512xbf16, #tpu.memory_space<vmem>>, vector<32x128xbf16>,
    %c0_5 = arith.constant 0 : index
    %c384 = arith.constant 384 : index
    %23 = vector.load %arg11[%c0_5, %c384] : memref<32x512xbf16, #tpu.memory_space<vmem>>, vector<32x128xbf16>
    tpu.vector_store %arg11[%c0_5, %c384], %21 {strides = array<i32>} : memref<32x512xbf16, #tpu.memory_space<vmem>>, vector<32x128xbf16>,
    %c0_6 = arith.constant 0 : index
    %c0_7 = arith.constant 0 : index
    %c0_8 = arith.constant 0 : index
    %24 = vector.load %arg1[%c0_6, %c0_7, %c0_8] : memref<1x32x256xf32, #tpu.memory_space<vmem>>, vector<1x32x256xf32>
    %25 = vector.shape_cast %24 : vector<1x32x256xf32> to vector<32x256xf32>
    %c0_9 = arith.constant 0 : index
    %c0_10 = arith.constant 0 : index
    %c0_11 = arith.constant 0 : index
    %26 = vector.load %arg1[%c0_9, %c0_10, %c0_11] : memref<1x32x256xf32, #tpu.memory_space<vmem>>, vector<1x32x256xf32>
    %27 = vector.shape_cast %26 : vector<1x32x256xf32> to vector<32x256xf32>
    %28 = arith.truncf %27 : vector<32x256xf32> to vector<32x256xbf16>
    %c0_12 = arith.constant 0 : index
    %c128 = arith.constant 128 : index
    %29 = vector.load %arg11[%c0_12, %c128] : memref<32x512xbf16, #tpu.memory_space<vmem>>, vector<32x256xbf16>
    tpu.vector_store %arg11[%c0_12, %c128], %28 {strides = array<i32>} : memref<32x512xbf16, #tpu.memory_space<vmem>>, vector<32x256xbf16>,
    %c0_13 = arith.constant 0 : index
    %c111 = arith.constant 111 : index
    %30 = vector.load %arg11[%c0_13, %c111] : memref<32x512xbf16, #tpu.memory_space<vmem>>, vector<32x256xbf16>
    %cst_14 = arith.constant 0.000000e+00 : f32
    %31 = arith.truncf %cst_14 : f32 to bf16
    %32 = vector.shape_cast %18 : vector<1x256xi1> to vector<1x256xi1>
    %33 = vector.broadcast %32 : vector<1x256xi1> to vector<32x256xi1>
    %34 = vector.broadcast %31 : bf16 to vector<32x256xbf16>
    %35 = arith.select %33, %30, %34 : vector<32x256xi1>, vector<32x256xbf16>
    %c0_15 = arith.constant 0 : index
    %c0_16 = arith.constant 0 : index
    %36 = vector.load %arg12[%c0_15, %c0_16] : memref<288x256xbf16, #tpu.memory_space<vmem>>, vector<32x256xbf16>
    tpu.vector_store %arg12[%c0_15, %c0_16], %35 {strides = array<i32>} : memref<288x256xbf16, #tpu.memory_space<vmem>>, vector<32x256xbf16>,
    %c0_17 = arith.constant 0 : index
    %c112 = arith.constant 112 : index
    %37 = vector.load %arg11[%c0_17, %c112] : memref<32x512xbf16, #tpu.memory_space<vmem>>, vector<32x256xbf16>
    %c32 = arith.constant 32 : index
    %c0_18 = arith.constant 0 : index
    %38 = vector.load %arg12[%c32, %c0_18] : memref<288x256xbf16, #tpu.memory_space<vmem>>, vector<32x256xbf16>
    tpu.vector_store %arg12[%c32, %c0_18], %37 {strides = array<i32>} : memref<288x256xbf16, #tpu.memory_space<vmem>>, vector<32x256xbf16>,
    %c0_19 = arith.constant 0 : index
    %c113 = arith.constant 113 : index
    %39 = vector.load %arg11[%c0_19, %c113] : memref<32x512xbf16, #tpu.memory_space<vmem>>, vector<32x256xbf16>
    %cst_20 = arith.constant 0.000000e+00 : f32
    %40 = arith.truncf %cst_20 : f32 to bf16
    %41 = vector.shape_cast %20 : vector<1x256xi1> to vector<1x256xi1>
    %42 = vector.broadcast %41 : vector<1x256xi1> to vector<32x256xi1>
    %43 = vector.broadcast %40 : bf16 to vector<32x256xbf16>
    %44 = arith.select %42, %39, %43 : vector<32x256xi1>, vector<32x256xbf16>
    %c64 = arith.constant 64 : index
    %c0_21 = arith.constant 0 : index
    %45 = vector.load %arg12[%c64, %c0_21] : memref<288x256xbf16, #tpu.memory_space<vmem>>, vector<32x256xbf16>
    tpu.vector_store %arg12[%c64, %c0_21], %44 {strides = array<i32>} : memref<288x256xbf16, #tpu.memory_space<vmem>>, vector<32x256xbf16>,
    %c0_22 = arith.constant 0 : index
    %c127 = arith.constant 127 : index
    %46 = vector.load %arg11[%c0_22, %c127] : memref<32x512xbf16, #tpu.memory_space<vmem>>, vector<32x256xbf16>
    %cst_23 = arith.constant 0.000000e+00 : f32
    %47 = arith.truncf %cst_23 : f32 to bf16
    %48 = vector.shape_cast %18 : vector<1x256xi1> to vector<1x256xi1>
    %49 = vector.broadcast %48 : vector<1x256xi1> to vector<32x256xi1>
    %50 = vector.broadcast %47 : bf16 to vector<32x256xbf16>
    %51 = arith.select %49, %46, %50 : vector<32x256xi1>, vector<32x256xbf16>
    %c96 = arith.constant 96 : index
    %c0_24 = arith.constant 0 : index
    %52 = vector.load %arg12[%c96, %c0_24] : memref<288x256xbf16, #tpu.memory_space<vmem>>, vector<32x256xbf16>
    tpu.vector_store %arg12[%c96, %c0_24], %51 {strides = array<i32>} : memref<288x256xbf16, #tpu.memory_space<vmem>>, vector<32x256xbf16>,
    %c0_25 = arith.constant 0 : index
    %c128_26 = arith.constant 128 : index
    %53 = vector.load %arg11[%c0_25, %c128_26] : memref<32x512xbf16, #tpu.memory_space<vmem>>, vector<32x256xbf16>
    %c128_27 = arith.constant 128 : index
    %c0_28 = arith.constant 0 : index
    %54 = vector.load %arg12[%c128_27, %c0_28] : memref<288x256xbf16, #tpu.memory_space<vmem>>, vector<32x256xbf16>
    tpu.vector_store %arg12[%c128_27, %c0_28], %53 {strides = array<i32>} : memref<288x256xbf16, #tpu.memory_space<vmem>>, vector<32x256xbf16>,
    %c0_29 = arith.constant 0 : index
    %c129 = arith.constant 129 : index
    %55 = vector.load %arg11[%c0_29, %c129] : memref<32x512xbf16, #tpu.memory_space<vmem>>, vector<32x256xbf16>
    %cst_30 = arith.constant 0.000000e+00 : f32
    %56 = arith.truncf %cst_30 : f32 to bf16
    %57 = vector.shape_cast %20 : vector<1x256xi1> to vector<1x256xi1>
    %58 = vector.broadcast %57 : vector<1x256xi1> to vector<32x256xi1>
    %59 = vector.broadcast %56 : bf16 to vector<32x256xbf16>
    %60 = arith.select %58, %55, %59 : vector<32x256xi1>, vector<32x256xbf16>
    %c160 = arith.constant 160 : index
    %c0_31 = arith.constant 0 : index
    %61 = vector.load %arg12[%c160, %c0_31] : memref<288x256xbf16, #tpu.memory_space<vmem>>, vector<32x256xbf16>
    tpu.vector_store %arg12[%c160, %c0_31], %60 {strides = array<i32>} : memref<288x256xbf16, #tpu.memory_space<vmem>>, vector<32x256xbf16>,
    %c0_32 = arith.constant 0 : index
    %c143 = arith.constant 143 : index
    %62 = vector.load %arg11[%c0_32, %c143] : memref<32x512xbf16, #tpu.memory_space<vmem>>, vector<32x256xbf16>
    %cst_33 = arith.constant 0.000000e+00 : f32
    %63 = arith.truncf %cst_33 : f32 to bf16
    %64 = vector.shape_cast %18 : vector<1x256xi1> to vector<1x256xi1>
    %65 = vector.broadcast %64 : vector<1x256xi1> to vector<32x256xi1>
    %66 = vector.broadcast %63 : bf16 to vector<32x256xbf16>
    %67 = arith.select %65, %62, %66 : vector<32x256xi1>, vector<32x256xbf16>
    %c192 = arith.constant 192 : index
    %c0_34 = arith.constant 0 : index
    %68 = vector.load %arg12[%c192, %c0_34] : memref<288x256xbf16, #tpu.memory_space<vmem>>, vector<32x256xbf16>
    tpu.vector_store %arg12[%c192, %c0_34], %67 {strides = array<i32>} : memref<288x256xbf16, #tpu.memory_space<vmem>>, vector<32x256xbf16>,
    %c0_35 = arith.constant 0 : index
    %c144 = arith.constant 144 : index
    %69 = vector.load %arg11[%c0_35, %c144] : memref<32x512xbf16, #tpu.memory_space<vmem>>, vector<32x256xbf16>
    %c224 = arith.constant 224 : index
    %c0_36 = arith.constant 0 : index
    %70 = vector.load %arg12[%c224, %c0_36] : memref<288x256xbf16, #tpu.memory_space<vmem>>, vector<32x256xbf16>
    tpu.vector_store %arg12[%c224, %c0_36], %69 {strides = array<i32>} : memref<288x256xbf16, #tpu.memory_space<vmem>>, vector<32x256xbf16>,
    %c0_37 = arith.constant 0 : index
    %c145 = arith.constant 145 : index
    %71 = vector.load %arg11[%c0_37, %c145] : memref<32x512xbf16, #tpu.memory_space<vmem>>, vector<32x256xbf16>
    %cst_38 = arith.constant 0.000000e+00 : f32
    %72 = arith.truncf %cst_38 : f32 to bf16
    %73 = vector.shape_cast %20 : vector<1x256xi1> to vector<1x256xi1>
    %74 = vector.broadcast %73 : vector<1x256xi1> to vector<32x256xi1>
    %75 = vector.broadcast %72 : bf16 to vector<32x256xbf16>
    %76 = arith.select %74, %71, %75 : vector<32x256xi1>, vector<32x256xbf16>
    %c256 = arith.constant 256 : index
    %c0_39 = arith.constant 0 : index
    %77 = vector.load %arg12[%c256, %c0_39] : memref<288x256xbf16, #tpu.memory_space<vmem>>, vector<32x256xbf16>
    tpu.vector_store %arg12[%c256, %c0_39], %76 {strides = array<i32>} : memref<288x256xbf16, #tpu.memory_space<vmem>>, vector<32x256xbf16>,
    %c0_40 = arith.constant 0 : index
    %c0_41 = arith.constant 0 : index
    %78 = vector.load %arg2[%c0_40, %c0_41] : memref<32x288xbf16, #tpu.memory_space<vmem>>, vector<32x288xbf16>
    %c0_42 = arith.constant 0 : index
    %c0_43 = arith.constant 0 : index
    %79 = vector.load %arg12[%c0_42, %c0_43] : memref<288x256xbf16, #tpu.memory_space<vmem>>, vector<288x256xbf16>
    %cst_44 = arith.constant dense<0.000000e+00> : vector<32x256xf32>
    %80 = tpu.matmul %78, %79, %cst_44 {dimension_numbers = #tpu.dot_dimension_numbers<[1], [0], [0], [1], [0, 0, 1, 1], [], []>} : vector<32x288xbf16>, vector<288x256xbf16>, vector<32x256xf32> -> vector<32x256xf32>
    %c0_45 = arith.constant 0 : index
    %c0_46 = arith.constant 0 : index
    %81 = vector.load %arg3[%c0_45, %c0_46] : memref<32x1xf32, #tpu.memory_space<vmem>>, vector<32x1xf32>
    %82 = vector.broadcast %81 : vector<32x1xf32> to vector<32x256xf32>
    %83 = arith.addf %80, %82 : vector<32x256xf32>
    %cst_47 = arith.constant 0.000000e+00 : f32
    %84 = vector.broadcast %cst_47 : f32 to vector<32x256xf32>
    %85 = arith.maximumf %83, %84 : vector<32x256xf32>
    %86 = arith.truncf %85 : vector<32x256xf32> to vector<32x256xbf16>
    %c0_48 = arith.constant 0 : index
    %c128_49 = arith.constant 128 : index
    %87 = vector.load %arg11[%c0_48, %c128_49] : memref<32x512xbf16, #tpu.memory_space<vmem>>, vector<32x256xbf16>
    tpu.vector_store %arg11[%c0_48, %c128_49], %86 {strides = array<i32>} : memref<32x512xbf16, #tpu.memory_space<vmem>>, vector<32x256xbf16>,
    %c0_50 = arith.constant 0 : index
    %c111_51 = arith.constant 111 : index
    %88 = vector.load %arg11[%c0_50, %c111_51] : memref<32x512xbf16, #tpu.memory_space<vmem>>, vector<32x256xbf16>
    %cst_52 = arith.constant 0.000000e+00 : f32
    %89 = arith.truncf %cst_52 : f32 to bf16
    %90 = vector.shape_cast %18 : vector<1x256xi1> to vector<1x256xi1>
    %91 = vector.broadcast %90 : vector<1x256xi1> to vector<32x256xi1>
    %92 = vector.broadcast %89 : bf16 to vector<32x256xbf16>
    %93 = arith.select %91, %88, %92 : vector<32x256xi1>, vector<32x256xbf16>
    %c0_53 = arith.constant 0 : index
    %c0_54 = arith.constant 0 : index
    %94 = vector.load %arg12[%c0_53, %c0_54] : memref<288x256xbf16, #tpu.memory_space<vmem>>, vector<32x256xbf16>
    tpu.vector_store %arg12[%c0_53, %c0_54], %93 {strides = array<i32>} : memref<288x256xbf16, #tpu.memory_space<vmem>>, vector<32x256xbf16>,
    %c0_55 = arith.constant 0 : index
    %c112_56 = arith.constant 112 : index
    %95 = vector.load %arg11[%c0_55, %c112_56] : memref<32x512xbf16, #tpu.memory_space<vmem>>, vector<32x256xbf16>
    %c32_57 = arith.constant 32 : index
    %c0_58 = arith.constant 0 : index
    %96 = vector.load %arg12[%c32_57, %c0_58] : memref<288x256xbf16, #tpu.memory_space<vmem>>, vector<32x256xbf16>
    tpu.vector_store %arg12[%c32_57, %c0_58], %95 {strides = array<i32>} : memref<288x256xbf16, #tpu.memory_space<vmem>>, vector<32x256xbf16>,
    %c0_59 = arith.constant 0 : index
    %c113_60 = arith.constant 113 : index
    %97 = vector.load %arg11[%c0_59, %c113_60] : memref<32x512xbf16, #tpu.memory_space<vmem>>, vector<32x256xbf16>
    %cst_61 = arith.constant 0.000000e+00 : f32
    %98 = arith.truncf %cst_61 : f32 to bf16
    %99 = vector.shape_cast %20 : vector<1x256xi1> to vector<1x256xi1>
    %100 = vector.broadcast %99 : vector<1x256xi1> to vector<32x256xi1>
    %101 = vector.broadcast %98 : bf16 to vector<32x256xbf16>
    %102 = arith.select %100, %97, %101 : vector<32x256xi1>, vector<32x256xbf16>
    %c64_62 = arith.constant 64 : index
    %c0_63 = arith.constant 0 : index
    %103 = vector.load %arg12[%c64_62, %c0_63] : memref<288x256xbf16, #tpu.memory_space<vmem>>, vector<32x256xbf16>
    tpu.vector_store %arg12[%c64_62, %c0_63], %102 {strides = array<i32>} : memref<288x256xbf16, #tpu.memory_space<vmem>>, vector<32x256xbf16>,
    %c0_64 = arith.constant 0 : index
    %c127_65 = arith.constant 127 : index
    %104 = vector.load %arg11[%c0_64, %c127_65] : memref<32x512xbf16, #tpu.memory_space<vmem>>, vector<32x256xbf16>
    %cst_66 = arith.constant 0.000000e+00 : f32
    %105 = arith.truncf %cst_66 : f32 to bf16
    %106 = vector.shape_cast %18 : vector<1x256xi1> to vector<1x256xi1>
    %107 = vector.broadcast %106 : vector<1x256xi1> to vector<32x256xi1>
    %108 = vector.broadcast %105 : bf16 to vector<32x256xbf16>
    %109 = arith.select %107, %104, %108 : vector<32x256xi1>, vector<32x256xbf16>
    %c96_67 = arith.constant 96 : index
    %c0_68 = arith.constant 0 : index
    %110 = vector.load %arg12[%c96_67, %c0_68] : memref<288x256xbf16, #tpu.memory_space<vmem>>, vector<32x256xbf16>
    tpu.vector_store %arg12[%c96_67, %c0_68], %109 {strides = array<i32>} : memref<288x256xbf16, #tpu.memory_space<vmem>>, vector<32x256xbf16>,
    %c0_69 = arith.constant 0 : index
    %c128_70 = arith.constant 128 : index
    %111 = vector.load %arg11[%c0_69, %c128_70] : memref<32x512xbf16, #tpu.memory_space<vmem>>, vector<32x256xbf16>
    %c128_71 = arith.constant 128 : index
    %c0_72 = arith.constant 0 : index
    %112 = vector.load %arg12[%c128_71, %c0_72] : memref<288x256xbf16, #tpu.memory_space<vmem>>, vector<32x256xbf16>
    tpu.vector_store %arg12[%c128_71, %c0_72], %111 {strides = array<i32>} : memref<288x256xbf16, #tpu.memory_space<vmem>>, vector<32x256xbf16>,
    %c0_73 = arith.constant 0 : index
    %c129_74 = arith.constant 129 : index
    %113 = vector.load %arg11[%c0_73, %c129_74] : memref<32x512xbf16, #tpu.memory_space<vmem>>, vector<32x256xbf16>
    %cst_75 = arith.constant 0.000000e+00 : f32
    %114 = arith.truncf %cst_75 : f32 to bf16
    %115 = vector.shape_cast %20 : vector<1x256xi1> to vector<1x256xi1>
    %116 = vector.broadcast %115 : vector<1x256xi1> to vector<32x256xi1>
    %117 = vector.broadcast %114 : bf16 to vector<32x256xbf16>
    %118 = arith.select %116, %113, %117 : vector<32x256xi1>, vector<32x256xbf16>
    %c160_76 = arith.constant 160 : index
    %c0_77 = arith.constant 0 : index
    %119 = vector.load %arg12[%c160_76, %c0_77] : memref<288x256xbf16, #tpu.memory_space<vmem>>, vector<32x256xbf16>
    tpu.vector_store %arg12[%c160_76, %c0_77], %118 {strides = array<i32>} : memref<288x256xbf16, #tpu.memory_space<vmem>>, vector<32x256xbf16>,
    %c0_78 = arith.constant 0 : index
    %c143_79 = arith.constant 143 : index
    %120 = vector.load %arg11[%c0_78, %c143_79] : memref<32x512xbf16, #tpu.memory_space<vmem>>, vector<32x256xbf16>
    %cst_80 = arith.constant 0.000000e+00 : f32
    %121 = arith.truncf %cst_80 : f32 to bf16
    %122 = vector.shape_cast %18 : vector<1x256xi1> to vector<1x256xi1>
    %123 = vector.broadcast %122 : vector<1x256xi1> to vector<32x256xi1>
    %124 = vector.broadcast %121 : bf16 to vector<32x256xbf16>
    %125 = arith.select %123, %120, %124 : vector<32x256xi1>, vector<32x256xbf16>
    %c192_81 = arith.constant 192 : index
    %c0_82 = arith.constant 0 : index
    %126 = vector.load %arg12[%c192_81, %c0_82] : memref<288x256xbf16, #tpu.memory_space<vmem>>, vector<32x256xbf16>
    tpu.vector_store %arg12[%c192_81, %c0_82], %125 {strides = array<i32>} : memref<288x256xbf16, #tpu.memory_space<vmem>>, vector<32x256xbf16>,
    %c0_83 = arith.constant 0 : index
    %c144_84 = arith.constant 144 : index
    %127 = vector.load %arg11[%c0_83, %c144_84] : memref<32x512xbf16, #tpu.memory_space<vmem>>, vector<32x256xbf16>
    %c224_85 = arith.constant 224 : index
    %c0_86 = arith.constant 0 : index
    %128 = vector.load %arg12[%c224_85, %c0_86] : memref<288x256xbf16, #tpu.memory_space<vmem>>, vector<32x256xbf16>
    tpu.vector_store %arg12[%c224_85, %c0_86], %127 {strides = array<i32>} : memref<288x256xbf16, #tpu.memory_space<vmem>>, vector<32x256xbf16>,
    %c0_87 = arith.constant 0 : index
    %c145_88 = arith.constant 145 : index
    %129 = vector.load %arg11[%c0_87, %c145_88] : memref<32x512xbf16, #tpu.memory_space<vmem>>, vector<32x256xbf16>
    %cst_89 = arith.constant 0.000000e+00 : f32
    %130 = arith.truncf %cst_89 : f32 to bf16
    %131 = vector.shape_cast %20 : vector<1x256xi1> to vector<1x256xi1>
    %132 = vector.broadcast %131 : vector<1x256xi1> to vector<32x256xi1>
    %133 = vector.broadcast %130 : bf16 to vector<32x256xbf16>
    %134 = arith.select %132, %129, %133 : vector<32x256xi1>, vector<32x256xbf16>
    %c256_90 = arith.constant 256 : index
    %c0_91 = arith.constant 0 : index
    %135 = vector.load %arg12[%c256_90, %c0_91] : memref<288x256xbf16, #tpu.memory_space<vmem>>, vector<32x256xbf16>
    tpu.vector_store %arg12[%c256_90, %c0_91], %134 {strides = array<i32>} : memref<288x256xbf16, #tpu.memory_space<vmem>>, vector<32x256xbf16>,
    %c0_92 = arith.constant 0 : index
    %c0_93 = arith.constant 0 : index
    %136 = vector.load %arg4[%c0_92, %c0_93] : memref<32x288xbf16, #tpu.memory_space<vmem>>, vector<32x288xbf16>
    %c0_94 = arith.constant 0 : index
    %c0_95 = arith.constant 0 : index
    %137 = vector.load %arg12[%c0_94, %c0_95] : memref<288x256xbf16, #tpu.memory_space<vmem>>, vector<288x256xbf16>
    %cst_96 = arith.constant dense<0.000000e+00> : vector<32x256xf32>
    %138 = tpu.matmul %136, %137, %cst_96 {dimension_numbers = #tpu.dot_dimension_numbers<[1], [0], [0], [1], [0, 0, 1, 1], [], []>} : vector<32x288xbf16>, vector<288x256xbf16>, vector<32x256xf32> -> vector<32x256xf32>
    %c0_97 = arith.constant 0 : index
    %c0_98 = arith.constant 0 : index
    %139 = vector.load %arg5[%c0_97, %c0_98] : memref<32x1xf32, #tpu.memory_space<vmem>>, vector<32x1xf32>
    %140 = vector.broadcast %139 : vector<32x1xf32> to vector<32x256xf32>
    %141 = arith.addf %138, %140 : vector<32x256xf32>
    %cst_99 = arith.constant dense<0.000000e+00> : vector<32xf32>
    %142 = vector.multi_reduction <add>, %141, %cst_99 [1] : vector<32x256xf32> to vector<32xf32>
    %143 = vector.shape_cast %142 : vector<32xf32> to vector<32x1xf32>
    %cst_100 = arith.constant 3.906250e-03 : f32
    %144 = vector.broadcast %cst_100 : f32 to vector<32x1xf32>
    %145 = arith.mulf %143, %144 : vector<32x1xf32>
    %c0_101 = arith.constant 0 : index
    %c0_102 = arith.constant 0 : index
    %146 = vector.load %arg6[%c0_101, %c0_102] : memref<32x2xf32, #tpu.memory_space<vmem>>, vector<32x2xf32>
    %147 = vector.broadcast %145 : vector<32x1xf32> to vector<32x2xf32>
    %148 = arith.mulf %147, %146 : vector<32x2xf32>
    %cst_103 = arith.constant dense<0.000000e+00> : vector<2xf32>
    %149 = vector.multi_reduction <add>, %148, %cst_103 [0] : vector<32x2xf32> to vector<2xf32>
    %150 = vector.shape_cast %149 : vector<2xf32> to vector<1x2xf32>
    %c0_104 = arith.constant 0 : index
    %c0_105 = arith.constant 0 : index
    %151 = vector.load %arg7[%c0_104, %c0_105] : memref<1x2xf32, #tpu.memory_space<vmem>>, vector<1x2xf32>
    %152 = arith.addf %150, %151 : vector<1x2xf32>
    %cst_106 = arith.constant 0.000000e+00 : f32
    %153 = vector.broadcast %cst_106 : f32 to vector<1x2xf32>
    %154 = arith.maximumf %152, %153 : vector<1x2xf32>
    %c0_107 = arith.constant 0 : index
    %c0_108 = arith.constant 0 : index
    %155 = vector.load %arg8[%c0_107, %c0_108] : memref<32x2xf32, #tpu.memory_space<vmem>>, vector<32x2xf32>
    %156 = vector.broadcast %154 : vector<1x2xf32> to vector<32x2xf32>
    %157 = arith.mulf %156, %155 : vector<32x2xf32>
    %cst_109 = arith.constant dense<0.000000e+00> : vector<32xf32>
    %158 = vector.multi_reduction <add>, %157, %cst_109 [1] : vector<32x2xf32> to vector<32xf32>
    %159 = vector.shape_cast %158 : vector<32xf32> to vector<32x1xf32>
    %c0_110 = arith.constant 0 : index
    %c0_111 = arith.constant 0 : index
    %160 = vector.load %arg9[%c0_110, %c0_111] : memref<32x1xf32, #tpu.memory_space<vmem>>, vector<32x1xf32>
    %161 = arith.addf %159, %160 : vector<32x1xf32>
    %162 = arith.negf %161 : vector<32x1xf32>
    %163 = math.exp %162 : vector<32x1xf32>
    %cst_112 = arith.constant 1.000000e+00 : f32
    %164 = vector.broadcast %cst_112 : f32 to vector<32x1xf32>
    %165 = arith.addf %164, %163 : vector<32x1xf32>
    %166 = arith.divf %164, %165 : vector<32x1xf32>
    %167 = vector.broadcast %166 : vector<32x1xf32> to vector<32x256xf32>
    %168 = arith.mulf %141, %167 : vector<32x256xf32>
    %169 = arith.addf %168, %25 : vector<32x256xf32>
    %c0_113 = arith.constant 0 : index
    %c0_114 = arith.constant 0 : index
    %c0_115 = arith.constant 0 : index
    %170 = vector.load %arg10[%c0_113, %c0_114, %c0_115] : memref<1x32x256xf32, #tpu.memory_space<vmem>>, vector<1x32x256xf32>
    %171 = vector.shape_cast %170 : vector<1x32x256xf32> to vector<32x256xf32>
    %172 = vector.shape_cast %169 : vector<32x256xf32> to vector<1x32x256xf32>
    tpu.vector_store %arg10[%c0_113, %c0_114, %c0_115], %172 {strides = array<i32>} : memref<1x32x256xf32, #tpu.memory_space<vmem>>, vector<1x32x256xf32>,
    return
  }
  func.func @transform_0(%arg0: i32) -> (i32, i32, i32) {
    %c0_i32 = arith.constant 0 : i32
    %c0_i32_0 = arith.constant 0 : i32
    %c0_i32_1 = arith.constant 0 : i32
    return %arg0, %c0_i32, %c0_i32_0 : i32, i32, i32
  }
  func.func @transform_1(%arg0: i32) -> (i32, i32) {
    %c0_i32 = arith.constant 0 : i32
    %c0_i32_0 = arith.constant 0 : i32
    %c0_i32_1 = arith.constant 0 : i32
    return %c0_i32, %c0_i32_0 : i32, i32
  }
  func.func @transform_2(%arg0: i32) -> (i32, i32) {
    %c0_i32 = arith.constant 0 : i32
    %c0_i32_0 = arith.constant 0 : i32
    %c0_i32_1 = arith.constant 0 : i32
    return %c0_i32, %c0_i32_0 : i32, i32
  }
  func.func @transform_3(%arg0: i32) -> (i32, i32) {
    %c0_i32 = arith.constant 0 : i32
    %c0_i32_0 = arith.constant 0 : i32
    %c0_i32_1 = arith.constant 0 : i32
    return %c0_i32, %c0_i32_0 : i32, i32
  }
  func.func @transform_4(%arg0: i32) -> (i32, i32) {
    %c0_i32 = arith.constant 0 : i32
    %c0_i32_0 = arith.constant 0 : i32
    %c0_i32_1 = arith.constant 0 : i32
    return %c0_i32, %c0_i32_0 : i32, i32
  }
  func.func @transform_5(%arg0: i32) -> (i32, i32) {
    %c0_i32 = arith.constant 0 : i32
    %c0_i32_0 = arith.constant 0 : i32
    %c0_i32_1 = arith.constant 0 : i32
    return %c0_i32, %c0_i32_0 : i32, i32
  }
  func.func @transform_6(%arg0: i32) -> (i32, i32) {
    %c0_i32 = arith.constant 0 : i32
    %c0_i32_0 = arith.constant 0 : i32
    %c0_i32_1 = arith.constant 0 : i32
    return %c0_i32, %c0_i32_0 : i32, i32
  }
  func.func @transform_7(%arg0: i32) -> (i32, i32) {
    %c0_i32 = arith.constant 0 : i32
    %c0_i32_0 = arith.constant 0 : i32
    %c0_i32_1 = arith.constant 0 : i32
    return %c0_i32, %c0_i32_0 : i32, i32
  }
  func.func @transform_8(%arg0: i32) -> (i32, i32) {
    %c0_i32 = arith.constant 0 : i32
    %c0_i32_0 = arith.constant 0 : i32
    %c0_i32_1 = arith.constant 0 : i32
    return %c0_i32, %c0_i32_0 : i32, i32
  }
  func.func @transform_9(%arg0: i32) -> (i32, i32, i32) {
    %c0_i32 = arith.constant 0 : i32
    %c0_i32_0 = arith.constant 0 : i32
    %c0_i32_1 = arith.constant 0 : i32
    return %arg0, %c0_i32, %c0_i32_0 : i32, i32, i32
  }
}

</mosaic_0001>

<bundles_post_ra>
// kernel: tpu_custom_call.1
= control target key start
LH: loop header
LB: loop body
LE: loop exit
PB: predicated region body
PF: predicated region fallthrough
CT: control target
= control target key end

     0   :  { %14 = vsyncpa [#allocation5], 0  ;;  %s2917_s0 = inlined_call_operand.vmem [shape: f32[2,32,256], index: 0, kind: input, shape index: {}]   ;;  %s2918_s1 = inlined_call_operand.hbm [shape: bf16[32,288], index: 1, kind: input, shape index: {}]   ;;  %s2919_s2 = inlined_call_operand.vmem [shape: f32[32,1], index: 2, kind: input, shape index: {}]   ;;  %s2920_s3 = inlined_call_operand.vmem [shape: bf16[32,288], index: 3, kind: input, shape index: {}]   ;;  %s2921_s4 = inlined_call_operand.vmem [shape: f32[32,1], index: 4, kind: input, shape index: {}]   ;;  %s2922_s5 = inlined_call_operand.vmem [shape: f32[32,2], index: 5, kind: input, shape index: {}]   ;;  %s2923_s6 = inlined_call_operand.vmem [shape: f32[1,2], index: 6, kind: input, shape index: {}]   ;;  %s2924_s7 = inlined_call_operand.vmem [shape: f32[32,2], index: 7, kind: input, shape index: {}]   ;;  %s2925_s8 = inlined_call_operand.vmem [shape: f32[32,1], index: 8, kind: input, shape index: {}]   ;;  %s2926_s9 = inlined_call_operand.hbm [shape: f32[2,32,256], index: 9, kind: output, shape index: {}]  }
   0x1   :  { %15 = vsyncpa [#allocation6], 0 }
   0x2   :  { %17 = vsyncpa [#allocation6 + $0x1], 0  ;;  %s2206_s30 = smov 0   ;;  %s2208_s10 = smov 0  }
   0x3   :  { %s2210_s11 = smov 0   ;;  %s2212_s12 = smov 0  }
   0x4 LB: > { %s2227_s13 = sadd.s32 4294967295, %s2140_s12   ;;  %s1814_s14 = sadd.s32 4294967294, %s2140_s12   ;;  %s2140_s12 = sphi %s2212_s12, %s2970_s12   ;;  %s2136_s11 = sphi %s2210_s11, %s2969_s11   ;;  %s2132_s10 = sphi %s2208_s10, %s2968_s10   ;;  %s2128_s30 = sphi %s2206_s30, %s2967_s30  }
   0x5   : > { %s2231_s15 = sadd.s32 1, %s2140_s12   ;;  %s224_s16 = sadd.s32 1, %s2136_s11 }
   0x6   : > { %s221_s17 = ssub.s32 %s2140_s12, %s2231_s15  ;;  %p234_p0 = scmp.ne.s32.totalorder %s2136_s11, %s2132_s10 }
   0x7   : > { %p222_p1 = scmp.eq.s32.totalorder %s221_s17, 0  ;;  %p235_p2 = scmp.eq.s32.totalorder %s2227_s13, 1 }
   0x8   : > { %p240_p3 = scmp.ne.s32.totalorder %s2132_s10, %s2128_s30  ;;  %p241_p4 = scmp.eq.s32.totalorder %s1814_s14, 1 }
   0x9   : > { %s2242_s18 = scalar_select %p222_p1, %s2136_s11, %s224_s16  }
   0xa   : > { %p2244_p5 = por %p235_p2, %p234_p0  ;;  %p2248_p6 = por %p241_p4, %p240_p3 }
   0xb   : > { %p1815_p7 = scmp.ge.s32.totalorder %s2140_s12, 1  ;;  %p248_p8 = scmp.lt.s32.totalorder %s2140_s12, 3 }
   0xc   : > { %s2941_s19 = scalar_select %p2244_p5, 1, 0 }
   0xd   : > { %s2942_s20 = scalar_select %p2248_p6, 1, 0 }
   0xe   : > { %p2927_p9 = scmp.eq.s32.totalorder %s2227_s13, 0  ;;  %p2255_p10 = pnand %p1815_p7, %p248_p8 }
   0xf   : > { %s2142_s22 = smov [#allocation4]   ;;  %s2046_s27 = scalar_lea.hbm %s2918_s1, 768 }
  0x10   : > { %s2943_s21 = scalar_select %p2255_p10, 1, 0 }
  0x11   : > { %s260_s23 = sshll.u32 %s2142_s22, 4  ;;  %p1888_p11 = pneg %p2255_p10  ;;  %s261_s23 = int_to_ptr.vmem [resolvable:$true] %s260_s23 }
  0x12   : > { %p2047_p13 = scmp.ne.s32.totalorder %s2918_s1, %s2046_s27  ;;  %p2053_p3 = scmp.lt.u32.totalorder %s2046_s27, %s2918_s1 }
  0x13   : > { %p2263_p12 = pnand %p2927_p9, %p1888_p11 }
  0x15   : > { %p2048_p0 = pneg %p2263_p12 }
  0x17   : > { %p2049_p1 = pnand %p2048_p0, %p2047_p13 }
  0x19   : > { %p2050_p2 = pneg %p2049_p1 }
  0x1b   : > { %p2055_p4 = pnand %p2053_p3, %p2050_p2 }
  0x1d   : > { %2058 = shalt.err (!%p2055_p4)
}
  0x1e   : > { %s2059_s17 = scalar_lea.vmem %s261_s23, 768  ;;  %p2067_p9 = scmp.lt.s32.totalorder %s261_s23, %s261_s23 }
  0x1f   : > { %p2060_p7 = scmp.ne.s32.totalorder %s261_s23, %s2059_s17  ;;  %p2068_p6 = scmp.lt.s32.totalorder %s2059_s17, %s2059_s17 }
  0x21   : > { %p2062_p8 = pnand %p2060_p7, %p2048_p0  ;;  %p2069_p5 = por %p2068_p6, %p2067_p9 }
  0x23   : > { %p2063_p11 = pneg %p2062_p8 }
  0x25   : > { %p2070_p10 = pnand %p2069_p5, %p2063_p11 }
  0x27   : > { %2073 = shalt.err (!%p2070_p10)
}
  0x28   : > { %s2143_s22 = smov 192   ;;  %s2144_s25 = smov 12  }
  0x29   : > { %1891 = dma.hbm_to_vmem [thread:$0]  (!%p2263_p12), %s2918_s1, 768, %s261_s23, [#allocation5], %s2143_s22, %s2143_s22, %s2144_s25  }
  0x2a   : > { %p2945_p13 = scmp.ne.s32.totalorder %s2943_s21, 0 }
  0x2b   : > { %v349_v0 = vlaneseq (!%p2945_p13)  ;;  %p2946_p0 = scmp.eq.s32.totalorder (!%p2945_p13), %s2227_s13, 0 }
  0x2c   : > { %305 = sbr.rel (%p2945_p13) target bundleno = 1582 (0x62e), region = 56 }
  0x33   : > { %2119 = dma.done.wait (%p2946_p0), [#allocation5], 768   ;;  %p2947_p1 = pmov %p2946_p0 }
  0x34   : > { %v2145_v1 = vmov 0   ;;  %v350_v2 = vand.u32 127, %v349_v0  ;;  %v413_v3 = vshrl.u32 %v349_v0, 7  ;;  %s2146_s21 = smov 111   ;;  %p341_p5 = scmp.lt.s32.totalorder %s2227_s13, 1  ;;  %vm424_vm6 = vcmask 908288  }
  0x35   : > { %2121 = vsyncadd (%p2947_p1), [#allocation5], 4294966528  ;;  %1974 = vset.pattern.permute.xlu0 %v2145_v1  ;;  %1975 = vset.pattern.permute.xlu1 %v2145_v1  ;;  %s2935_s23 = smov 113   ;;  %s2937_s27 = smov 127   ;;  %vm527_vm9 = vcmask 924672   ;;  %vm579_vm12 = vcmask 1039360  }
  0x36   : > { %v351_v4 = vadd.s32 128, %v350_v2  ;;  %v356_v5 = vand.u32 15, %v350_v2  ;;  %v2291_v7 = vsub.s32 0, %v413_v3  ;;  %v418_v8 = vsub.s32 4, %v413_v3  ;;  %s342_s24 = scalar_select %p341_p5, %s2227_s13, 1 }
  0x37   : > { %s2149_s22 = smov 1   ;;  %s2150_s25 = smov 15   ;;  %v2008_v62 = vld [vmem:[#allocation4 + $0x4] ss:$12 sps:$4 sm:$0xff]  }
  0x38   : > { %v363_v6 = vand.u32 15, %v351_v4  ;;  %vm376_vm0 = vcmp.ge.s32.totalorder %v356_v5, 1  ;;  %vm378_vm1 = vcmp.le.s32.totalorder %v356_v5, 14  ;;  %s1848_s29 = sshll.u32 %s342_s24, 6  ;;  %s2151_s26 = smov 17   ;;  %953 = vmatprep.mubr.bf16.mxu0 %v2008_v62 }
  0x39   : > { %s2308_s17 = scalar_lea.vmem %s2917_s0, %s1848_s29  ;;  %s2152_s28 = smov 16  }
  0x3a   : > { %vm377_vm2 = vcmp.ge.s32.totalorder %v363_v6, 1  ;;  %vm379_vm3 = vcmp.le.s32.totalorder %v363_v6, 14  ;;  %v384_v15 = vld [vmem:[%s2308_s17] sm:$0xff]  ;;  %v386_v16 = vld [vmem:[%s2308_s17 + $0x10] sm:$0xff]  ;;  %v385_v18 = vld [vmem:[%s2308_s17 + $0x8] sm:$0xff]  ;;  %s2933_s24 = smov 112  }
  0x3b   : > { %vm410_vm4 = vmpackc.low %vm377_vm2, %vm376_vm0  ;;  %v2316_v17 = vpack.c.bf16 %v386_v16, %v384_v15  ;;  %v387_v19 = vld [vmem:[%s2308_s17 + $0x18] sm:$0xff]  ;;  %v389_v21 = vld [vmem:[%s2308_s17 + $0x28] sm:$0xff]  ;;  %vm2939_vm0 = vcmask 7168   ;;  %vm556_vm2 = vcmask 121856   ;;  %p2965_p9 = scmp.ne.s32.totalorder %s2941_s19, 0  ;;  %s2154_s14 = smov [#allocation7]  }
  0x3c   : > { %v411_v9 = vsel %vm410_vm4, 65537, %v2145_v1  ;;  %vm513_vm5 = vmpackc.low %vm379_vm3, %vm378_vm1  ;;  %v2322_v20 = vpack.c.bf16 %v387_v19, %v385_v18  ;;  %v391_v22 = vld [vmem:[%s2308_s17 + $0x38] sm:$0xff]  ;;  %v388_v29 = vld [vmem:[%s2308_s17 + $0x20] sm:$0xff] }
  0x3d   : > { %v415_v10 = vrot.slane %v411_v9, %v2291_v7  ;;  %v514_v11 = vsel %vm513_vm5, 65537, %v2145_v1  ;;  %v419_v13 = vrot.slane %v411_v9, %v418_v8  ;;  %v2332_v24 = vpack.c.bf16 %v391_v22, %v389_v21  ;;  %v390_v30 = vld [vmem:[%s2308_s17 + $0x30] sm:$0xff] }
  0x3e   : > { %v518_v12 = vrot.slane %v514_v11, %v2291_v7  ;;  %v522_v14 = vrot.slane %v514_v11, %v418_v8  ;;  %v2355_v33 = vpack.c.bf16 %v390_v30, %v388_v29  ;;  %vm453_vm5 = vcmask 138240  }
  0x3f   : > { %420 = vrot.lane.b32.xlu0 %v415_v10, %s2146_s21 }
  0x40   : > { %523 = vrot.lane.b32.xlu1 %v518_v12, %s2935_s23 }
  0x43   : > { %422 = vrot.lane.b32.xlu0 %v419_v13, %s2146_s21 }
  0x44   : > { %525 = vrot.lane.b32.xlu1 %v522_v14, %s2935_s23 }
  0x47   : > { %575 = vrot.lane.b32.xlu0 %v415_v10, %s2937_s27 }
  0x48   : > { %577 = vrot.lane.b32.xlu1 %v419_v13, %s2937_s27 }
  0x4b   : > { %635 = vrot.lane.b32.xlu0 %v518_v12, %s2149_s22 }
  0x4c   : > { %637 = vrot.lane.b32.xlu1 %v522_v14, %s2149_s22 }
  0x4f   : > { %685 = vrot.lane.b32.xlu0 %v415_v10, %s2150_s25 }
  0x50   : > { %687 = vrot.lane.b32.xlu1 %v419_v13, %s2150_s25 }
  0x53   : > { %1945 = vrot.lane.b32.xlu0 %v2145_v1, %s2151_s26 }
  0x54   : > { %480 = vrot.lane.b32.xlu1 %v2316_v17, %s2152_s28 }
  0x57   : > { %482 = vrot.lane.b32.xlu0 %v2322_v20, %s2152_s28 }
  0x58   : > { %1950 = vrot.lane.b32.xlu1 %v2145_v1, %s2152_s28 }
  0xb1   : > { %v421_v23 = vpop.permute.xlu0 %420 }
  0xb2   : > { %v524_v31 = vpop.permute.xlu1 %523 }
  0xb5   : > { %v2334_v25 = vpop.permute.xlu0 %422 }
  0xb6   : > { %v2338_v26 = vsel %vm424_vm6, %v421_v23, %v2334_v25  ;;  %vm428_vm7 = vcmp.ne.s16.totalorder %v2334_v25, 0  ;;  %v2362_v35 = vpop.permute.xlu1 %525 }
  0xb7   : > { %v434_v27 = vsel %vm428_vm7, %v2332_v24, 0  ;;  %v431_v28 = vsel %vm428_vm7, %v2322_v20, 0  ;;  %vm427_vm8 = vcmp.ne.s16.totalorder %v2338_v26, 0  ;;  %vm531_vm10 = vcmp.ne.s16.totalorder %v2362_v35, 0 }
  0xb8   : > { %451 = vrot.lane.b32.xlu0 %v434_v27, %s2151_s26  ;;  %445 = vrot.lane.b32.xlu1 %v431_v28, %s2151_s26  ;;  %v430_v32 = vsel %vm427_vm8, %v2316_v17, 0  ;;  %v433_v34 = vsel %vm427_vm8, %v2355_v33, 0  ;;  %v2369_v36 = vsel %vm527_vm9, %v524_v31, %v2362_v35  ;;  %v534_v37 = vsel %vm531_vm10, %v2322_v20, 0 }
  0xb9   : > { %vm530_vm11 = vcmp.ne.s16.totalorder %v2369_v36, 0  ;;  %v576_v39 = vpop.permute.xlu0 %575  ;;  %v537_v43 = vsel %vm531_vm10, %v2332_v24, 0 }
  0xba   : > { %v2382_v38 = vpop.permute.xlu1 %577  ;;  %v533_v40 = vsel %vm530_vm11, %v2316_v17, 0  ;;  %v536_v42 = vsel %vm530_vm11, %v2355_v33, 0 }
  0xbb   : > { %v2389_v41 = vsel %vm579_vm12, %v576_v39, %v2382_v38  ;;  %vm583_vm13 = vcmp.ne.s16.totalorder %v2382_v38, 0 }
  0xbc   : > { %774 = vrot.lane.b32.xlu1 %v522_v14, %s2151_s26  ;;  %443 = vrot.lane.b32.xlu0 %v430_v32, %s2151_s26  ;;  %vm582_vm14 = vcmp.ne.s16.totalorder %v2389_v41, 0  ;;  %v586_v45 = vsel %vm583_vm13, %v2322_v20, 0  ;;  %v589_v47 = vsel %vm583_vm13, %v2332_v24, 0 }
  0xbd   : > { %v585_v44 = vsel %vm582_vm14, %v2316_v17, 0  ;;  %v2410_v46 = vpop.permute.xlu0 %635  ;;  %v588_v48 = vsel %vm582_vm14, %v2355_v33, 0 }
  0xbe   : > { %vm2931_vm15 = vcmp.ne.s16.totalorder %v2410_v46, 0  ;;  %v638_v50 = vpop.permute.xlu1 %637 }
  0xbf   : > { %v643_v51 = vsel %vm2931_vm15, %v2316_v17, 0  ;;  %v2431_v52 = vsel %vm2939_vm0, %v2410_v46, %v638_v50  ;;  %v646_v54 = vsel %vm2931_vm15, %v2355_v33, 0 }
  0xc0   : > { %449 = vrot.lane.b32.xlu1 %v433_v34, %s2151_s26  ;;  %772 = vrot.lane.b32.xlu0 %v518_v12, %s2151_s26  ;;  %vm641_vm3 = vcmp.ne.s16.totalorder %v2431_v52, 0 }
  0xc1   : > { %v2421_v49 = vpop.permute.xlu0 %685  ;;  %v644_v57 = vsel %vm641_vm3, %v2322_v20, 0  ;;  %v647_v58 = vsel %vm641_vm3, %v2332_v24, 0 }
  0xc2   : > { %vm2930_vm1 = vcmp.ne.s16.totalorder %v2421_v49, 0  ;;  %v688_v53 = vpop.permute.xlu1 %687 }
  0xc3   : > { %v693_v55 = vsel %vm2930_vm1, %v2316_v17, 0  ;;  %v2445_v56 = vsel %vm556_vm2, %v2421_v49, %v688_v53  ;;  %v696_v60 = vsel %vm2930_vm1, %v2355_v33, 0  ;;  %vm490_vm1 = vcmask 130048   ;;  %v862_v53 = vld [vmem:[%s2919_s2 + $0x10] sm:$0xff] }
  0xc4   : > { %486 = vrot.lane.b32.xlu0 %v2355_v33, %s2152_s28  ;;  %488 = vrot.lane.b32.xlu1 %v2332_v24, %s2152_s28  ;;  %vm2932_vm4 = vcmp.ne.s16.totalorder %v2445_v56, 0 }
  0xc5   : > { %v694_v59 = vsel %vm2932_vm4, %v2322_v20, 0  ;;  %v697_v61 = vsel %vm2932_vm4, %v2332_v24, 0  ;;  %v1946_v63 = vpop.permute.xlu0 %1945 }
  0xc6   : > { %v481_v0 = vpop.permute.xlu1 %480  ;;  %v1947_v6 = vunpack.i.l.bf16 %v1946_v63  ;;  %v1948_v12 = vunpack.i.h.bf16 %v1946_v63 }
  0xc8   : > { %548 = vrot.lane.b32.xlu1 %v534_v37, %s2150_s25  ;;  %1955 = vrot.lane.b32.xlu0 %v2145_v1, %s2150_s25 }
  0xc9   : > { %v483_v2 = vpop.permute.xlu0 %482 }
  0xca   : > { %v1951_v3 = vpop.permute.xlu1 %1950  ;;  %v492_v22 = vsel %vm490_vm1, %v481_v0, %v483_v2 }
  0xcb   : > { %v1952_v19 = vunpack.i.l.bf16 %v1951_v3  ;;  %v1953_v34 = vunpack.i.h.bf16 %v1951_v3 }
  0xcc   : > { %1960 = vrot.lane.b32.xlu1 %v2145_v1, %s2149_s22  ;;  %546 = vrot.lane.b32.xlu0 %v533_v40, %s2150_s25 }
  0xcd   : > { %v491_v30 = vsel %vm490_vm1, %v1952_v19, %v481_v0 }
  0xd0   : > { %552 = vrot.lane.b32.xlu1 %v536_v42, %s2150_s25  ;;  %554 = vrot.lane.b32.xlu0 %v537_v43, %s2150_s25  ;;  %v861_v43 = vld [vmem:[%s2919_s2 + $0x8] sm:$0xff] }
  0xd4   : > { %598 = vrot.lane.b32.xlu1 %v585_v44, %s2149_s22  ;;  %600 = vrot.lane.b32.xlu0 %v586_v45, %s2149_s22 }
  0xd8   : > { %606 = vrot.lane.b32.xlu1 %v589_v47, %s2149_s22  ;;  %604 = vrot.lane.b32.xlu0 %v588_v48, %s2149_s22  ;;  %v860_v47 = vld [vmem:[%s2919_s2] sm:$0xff] }
  0xdc   : > { %655 = vrot.lane.b32.xlu0 %v643_v51, %s2937_s27  ;;  %1965 = vrot.lane.b32.xlu1 %v2145_v1, %s2937_s27 }
  0xe0   : > { %661 = vrot.lane.b32.xlu0 %v646_v54, %s2937_s27  ;;  %705 = vrot.lane.b32.xlu1 %v693_v55, %s2935_s23 }
  0xe4   : > { %657 = vrot.lane.b32.xlu0 %v644_v57, %s2937_s27  ;;  %663 = vrot.lane.b32.xlu1 %v647_v58, %s2937_s27  ;;  %v863_v57 = vld [vmem:[%s2919_s2 + $0x18] sm:$0xff]  ;;  %s2950_s27 = smov 113  }
  0xe8   : > { %1970 = vrot.lane.b32.xlu0 %v2145_v1, %s2935_s23  ;;  %707 = vrot.lane.b32.xlu1 %v694_v59, %s2935_s23 }
  0xec   : > { %743 = vrot.lane.b32.xlu0 %v2322_v20, %s2933_s24  ;;  %711 = vrot.lane.b32.xlu1 %v696_v60, %s2935_s23 }
  0xf0   : > { %713 = vrot.lane.b32.xlu0 %v697_v61, %s2935_s23  ;;  %745 = vrot.lane.b32.xlu1 %v2145_v1, %s2933_s24  ;;  %s2948_s23 = smov 127  }
  0xf4   : > { %741 = vrot.lane.b32.xlu0 %v2316_v17, %s2933_s24  ;;  %749 = vrot.lane.b32.xlu1 %v2332_v24, %s2933_s24 }
  0xf8   : > { %751 = vrot.lane.b32.xlu0 %v2145_v1, %s2933_s24  ;;  %747 = vrot.lane.b32.xlu1 %v2355_v33, %s2933_s24 }
  0xfc   : > { %796 = vrot.lane.b32.xlu1 %v2145_v1, %s2146_s21 }
 0x12a   : > { %v452_v4 = vpop.permute.xlu0 %451  ;;  %v446_v5 = vpop.permute.xlu1 %445 }
 0x12e   : > { %v775_v8 = vpop.permute.xlu1 %774  ;;  %v444_v9 = vpop.permute.xlu0 %443 }
 0x12f   : > { %v455_v10 = vsel %vm453_vm5, %v444_v9, %v446_v5  ;;  %v454_v11 = vsel %vm453_vm5, %v1947_v6, %v444_v9 }
 0x130   : > { %921 = vmatprep.subr.bf16.mxu0 %v455_v10 }
 0x131   : > { %922 = vmatpush1.bf16.msra.mxu0 %v454_v11 }
 0x132   : > { %v450_v13 = vpop.permute.xlu1 %449  ;;  %v2488_v14 = vpop.permute.xlu0 %772 }
 0x133   : > { %v2492_v15 = vsel %vm453_vm5, %v2488_v14, %v775_v8  ;;  %vm777_vm15 = vcmp.ne.s16.totalorder %v2488_v14, 0  ;;  %v457_v16 = vsel %vm453_vm5, %v450_v13, %v452_v4  ;;  %v456_v18 = vsel %vm453_vm5, %v1948_v12, %v450_v13  ;;  %v1422_v14 = vld [vmem:[%s2921_s4 + $0x18] sm:$0xff] }
 0x134   : > { %vm778_vm4 = vcmp.ne.s16.totalorder %v2492_v15, 0  ;;  %923 = vmatprep.subr.bf16.mxu0 %v457_v16  ;;  %v780_v21 = vsel %vm777_vm15, %v2316_v17, 0  ;;  %v783_v32 = vsel %vm777_vm15, %v2355_v33, 0  ;;  %v1420_v15 = vld [vmem:[%s2921_s4 + $0x8] sm:$0xff] }
 0x135   : > { %924 = vmatpush1.bf16.msra.mxu0 %v456_v18  ;;  %792 = vrot.lane.b32.xlu0 %v780_v21, %s2146_s21  ;;  %v784_v23 = vsel %vm778_vm4, %v2332_v24, 0  ;;  %v781_v31 = vsel %vm778_vm4, %v2322_v20, 0 }
 0x136   : > { %925 = vmatprep.subr.bf16.mxu0 %v492_v22  ;;  %800 = vrot.lane.b32.xlu1 %v784_v23, %s2146_s21  ;;  %v487_v27 = vpop.permute.xlu0 %486  ;;  %v489_v28 = vpop.permute.xlu1 %488 }
 0x137   : > { %v494_v29 = vsel %vm490_vm1, %v487_v27, %v489_v28  ;;  %v493_v42 = vsel %vm490_vm1, %v1953_v34, %v487_v27 }
 0x139   : > { %926 = vmatpush1.bf16.msra.mxu0 %v491_v30  ;;  %794 = vrot.lane.b32.xlu0 %v781_v31, %s2146_s21 }
 0x13a   : > { %798 = vrot.lane.b32.xlu1 %v783_v32, %s2146_s21  ;;  %927 = vmatprep.subr.bf16.mxu0 %v494_v29  ;;  %v549_v37 = vpop.permute.xlu1 %548  ;;  %v1956_v39 = vpop.permute.xlu0 %1955 }
 0x13b   : > { %v1957_v40 = vunpack.i.l.bf16 %v1956_v39  ;;  %v1958_v48 = vunpack.i.h.bf16 %v1956_v39 }
 0x13d   : > { %802 = vrot.lane.b32.xlu0 %v2145_v1, %s2146_s21  ;;  %928 = vmatpush1.bf16.msra.mxu0 %v493_v42 }
 0x13e   : > { %v1961_v44 = vpop.permute.xlu1 %1960  ;;  %v547_v45 = vpop.permute.xlu0 %546  ;;  %871 = vperm.xlu1 %1975, %v861_v43  }
 0x13f   : > { %v558_v50 = vsel %vm556_vm2, %v547_v45, %v549_v37  ;;  %v557_v51 = vsel %vm556_vm2, %v1957_v40, %v547_v45  ;;  %v1962_v58 = vunpack.i.l.bf16 %v1961_v44  ;;  %v1963_v63 = vunpack.i.h.bf16 %v1961_v44 }
 0x140   : > { %929 = vmatprep.subr.bf16.mxu0 %v558_v50  ;;  %v2006_v50 = vld [vmem:[#allocation4] ss:$12 sps:$4 sm:$0xff]  }
 0x141   : > { %930 = vmatpush1.bf16.msra.mxu0 %v557_v51  ;;  %866 = vperm.xlu0 %1974, %v860_v47   ;;  %v2009_v51 = vld [vmem:[#allocation4 + $0x1c] ss:$12 sps:$4 sm:$0xff]  }
 0x142   : > { %v553_v54 = vpop.permute.xlu1 %552  ;;  %v555_v55 = vpop.permute.xlu0 %554  ;;  %876 = vperm.xlu1 %1975, %v862_v53   ;;  %v2011_v53 = vld [vmem:[#allocation4 + $0x18] ss:$12 sps:$4 sm:$0xff]  }
 0x143   : > { %v560_v59 = vsel %vm556_vm2, %v553_v54, %v555_v55  ;;  %v559_v60 = vsel %vm556_vm2, %v1958_v48, %v553_v54 }
 0x144   : > { %931 = vmatprep.subr.bf16.mxu0 %v560_v59 }
 0x145   : > { %932 = vmatpush1.bf16.msra.mxu0 %v559_v60  ;;  %881 = vperm.xlu0 %1974, %v863_v57  }
 0x146   : > { %v599_v61 = vpop.permute.xlu1 %598  ;;  %v601_v62 = vpop.permute.xlu0 %600  ;;  %1977 = vrot.lane.b32.xlu1 %v2145_v1, %s2151_s26 }
 0x147   : > { %v610_v0 = vsel %vm2939_vm0, %v599_v61, %v601_v62  ;;  %v609_v2 = vsel %vm2939_vm0, %v1962_v58, %v599_v61 }
 0x148   : > { %933 = vmatprep.subr.bf16.mxu0 %v610_v0 }
 0x149   : > { %934 = vmatpush1.bf16.msra.mxu0 %v609_v2  ;;  %v2012_v2 = vld [vmem:[#allocation4 + $0x8] ss:$12 sps:$4 sm:$0xff]   ;;  %1982 = vrot.lane.b32.xlu0 %v2145_v1, %s2152_s28 }
 0x14a   : > { %v607_v3 = vpop.permute.xlu1 %606  ;;  %v605_v4 = vpop.permute.xlu0 %604 }
 0x14b   : > { %v612_v5 = vsel %vm2939_vm0, %v605_v4, %v607_v3  ;;  %v611_v6 = vsel %vm2939_vm0, %v1963_v63, %v605_v4  ;;  %vm2940_vm0 = vcmask 916480   ;;  %v2013_v3 = vld [vmem:[#allocation4 + $0x20] ss:$12 sps:$4 sm:$0xff]  }
 0x14c   : > { %935 = vmatprep.subr.bf16.mxu0 %v612_v5 }
 0x14d   : > { %936 = vmatpush1.bf16.msra.mxu0 %v611_v6 }
 0x14e   : > { %v656_v8 = vpop.permute.xlu0 %655  ;;  %937 = vmatprep.subr.bf16.mxu0 %v2322_v20  ;;  %v1966_v9 = vpop.permute.xlu1 %1965 }
 0x14f   : > { %v1968_v12 = vunpack.i.h.bf16 %v1966_v9  ;;  %v1967_v13 = vunpack.i.l.bf16 %v1966_v9 }
 0x151   : > { %938 = vmatpush1.bf16.msra.mxu0 %v2316_v17 }
 0x152   : > { %v662_v10 = vpop.permute.xlu0 %661  ;;  %939 = vmatprep.subr.bf16.mxu0 %v2332_v24  ;;  %v706_v11 = vpop.permute.xlu1 %705 }
 0x155   : > { %940 = vmatpush1.bf16.msra.mxu0 %v2355_v33 }
 0x156   : > { %v658_v16 = vpop.permute.xlu0 %657  ;;  %v664_v18 = vpop.permute.xlu1 %663 }
 0x157   : > { %v668_v19 = vsel %vm579_vm12, %v658_v16, %v1967_v13  ;;  %v667_v21 = vsel %vm579_vm12, %v656_v8, %v658_v16  ;;  %v670_v22 = vsel %vm579_vm12, %v664_v18, %v1968_v12  ;;  %v669_v17 = vsel %vm579_vm12, %v662_v10, %v664_v18 }
 0x158   : > { %941 = vmatprep.subr.bf16.mxu0 %v668_v19 }
 0x159   : > { %942 = vmatpush1.bf16.msra.mxu0 %v667_v21 }
 0x15a   : > { %v1971_v20 = vpop.permute.xlu0 %1970  ;;  %943 = vmatprep.subr.bf16.mxu0 %v670_v22  ;;  %v708_v24 = vpop.permute.xlu1 %707 }
 0x15b   : > { %v1972_v23 = vunpack.i.l.bf16 %v1971_v20  ;;  %v717_v28 = vsel %vm527_vm9, %v706_v11, %v708_v24  ;;  %v1973_v30 = vunpack.i.h.bf16 %v1971_v20 }
 0x15d   : > { %944 = vmatpush1.bf16.msra.mxu0 %v669_v17  ;;  %v718_v27 = vsel %vm527_vm9, %v708_v24, %v1972_v23 }
 0x15e   : > { %v744_v33 = vpop.permute.xlu0 %743  ;;  %945 = vmatprep.subr.bf16.mxu0 %v718_v27  ;;  %v712_v29 = vpop.permute.xlu1 %711 }
 0x161   : > { %946 = vmatpush1.bf16.msra.mxu0 %v717_v28 }
 0x162   : > { %v714_v31 = vpop.permute.xlu0 %713  ;;  %v746_v32 = vpop.permute.xlu1 %745 }
 0x163   : > { %v720_v34 = vsel %vm527_vm9, %v714_v31, %v1973_v30  ;;  %v719_v37 = vsel %vm527_vm9, %v712_v29, %v714_v31  ;;  %v755_v39 = vsel %vm2940_vm0, %v744_v33, %v746_v32 }
 0x164   : > { %947 = vmatprep.subr.bf16.mxu0 %v720_v34 }
 0x165   : > { %948 = vmatpush1.bf16.msra.mxu0 %v719_v37 }
 0x166   : > { %v742_v40 = vpop.permute.xlu0 %741  ;;  %949 = vmatprep.subr.bf16.mxu0 %v755_v39  ;;  %v750_v42 = vpop.permute.xlu1 %749 }
 0x167   : > { %v754_v43 = vsel %vm2940_vm0, %v742_v40, %v744_v33 }
 0x169   : > { %950 = vmatpush1.bf16.msra.mxu0 %v754_v43 }
 0x16a   : > { %v752_v44 = vpop.permute.xlu0 %751  ;;  %v748_v45 = vpop.permute.xlu1 %747 }
 0x16b   : > { %v757_v47 = vsel %vm2940_vm0, %v750_v42, %v752_v44  ;;  %v756_v48 = vsel %vm2940_vm0, %v748_v45, %v750_v42  ;;  %vm914_vm0 = vcmask 261120  }
 0x16c   : > { %951 = vmatprep.subr.bf16.mxu0 %v757_v47 }
 0x16d   : > { %952 = vmatpush1.bf16.msra.mxu0 %v756_v48 }
 0x16e   : > { %v797_v54 = vpop.permute.xlu1 %796 }
 0x170   : > { %954 = vmatmul.mubr.bf16.vlgmr.msra.gmra.mrb[0].mxu0 %v2006_v50 }
 0x171   : > { %963 = vmatprep.mubr.bf16.mxu0 %v2009_v51 }
 0x178   : > { %964 = vmatmul.mubr.bf16.gmra.mrb[4].mxu0 %v2011_v53 }
 0x179   : > { %1006 = vmatprep.mubr.bf16.mxu0 %v2145_v1 }
 0x1a7   : > { %v793_v55 = vpop.permute.xlu0 %792 }
 0x1a8   : > { %v801_v57 = vpop.permute.xlu1 %800 }
 0x1ab   : > { %v795_v58 = vpop.permute.xlu0 %794 }
 0x1ac   : > { %v804_v59 = vsel %vm424_vm6, %v793_v55, %v795_v58  ;;  %v805_v60 = vsel %vm424_vm6, %v795_v58, %v797_v54  ;;  %v799_v61 = vpop.permute.xlu1 %798 }
 0x1ad   : > { %974 = vmatprep.subr.bf16.mxu0 %v805_v60  ;;  %v806_v0 = vsel %vm424_vm6, %v799_v61, %v801_v57 }
 0x1ae   : > { %975 = vmatpush1.bf16.msra.mxu0 %v804_v59 }
 0x1af   : > { %v803_v62 = vpop.permute.xlu0 %802 }
 0x1b0   : > { %v807_v63 = vsel %vm424_vm6, %v801_v57, %v803_v62 }
 0x1b1   : > { %976 = vmatprep.subr.bf16.mxu0 %v807_v63 }
 0x1b2   : > { %977 = vmatpush1.bf16.msra.mxu0 %v806_v0  ;;  %v1419_v0 = vld [vmem:[%s2921_s4] sm:$0xff] }
 0x1b5   : > { %1829 = vmatmul.mubr.msk.bf16.vlgmr.msra.gmra.mrb[0].mxu0 %vm914_vm0, %v2012_v2  ;;  %v1421_v2 = vld [vmem:[%s2921_s4 + $0x10] sm:$0xff] }
 0x1b6   : > { %1016 = vmatprep.mubr.bf16.mxu0 %v2145_v1 }
 0x1bd   : > { %1830 = vmatmul.mubr.msk.bf16.gmra.mrb[4].mxu0 %vm914_vm0, %v2013_v3  ;;  %v872_v10 = vpop.permute.xlu1 %871 }
 0x1c0   : > { %v867_v4 = vpop.permute.xlu0 %866 }
 0x1c1   : > { %v877_v24 = vpop.permute.xlu1 %876 }
 0x1c4   : > { %v882_v29 = vpop.permute.xlu0 %881 }
 0x1c8   : > { %v1983_v3 = vpop.permute.xlu0 %1982 }
 0x288   : > { %v1008_v5 = vpop.f32.mrb[0].mxu0 }
 0x289   : > { %v1850_v6 = vadd.f32 %v1008_v5, %v867_v4  ;;  %v1010_v8 = vpop.f32.mrb[1].mxu0 }
 0x28a   : > { %v1851_v9 = vadd.f32 %v1010_v8, %v867_v4  ;;  %v1012_v11 = vpop.f32.mrb[2].mxu0  ;;  %v1978_v4 = vpop.permute.xlu1 %1977 }
 0x28b   : > { %v1852_v12 = vadd.f32 %v1012_v11, %v872_v10  ;;  %v1014_v13 = vpop.f32.mrb[3].mxu0  ;;  %v1027_v18 = vmax.f32 %v1850_v6, 0.0  ;;  %v1979_v8 = vunpack.i.l.bf16 %v1978_v4 }
 0x28c   : > { %v1853_v16 = vadd.f32 %v1014_v13, %v872_v10  ;;  %v1028_v21 = vmax.f32 %v1851_v9, 0.0 }
 0x28d   : > { %v1029_v19 = vmax.f32 %v1852_v12, 0.0 }
 0x28e   : > { %v1030_v22 = vmax.f32 %v1853_v16, 0.0  ;;  %v1980_v16 = vunpack.i.h.bf16 %v1978_v4 }
 0x28f   : > { %v2568_v20 = vpack.c.bf16 %v1029_v19, %v1027_v18 }
 0x290   : > { %v2570_v17 = vpack.c.bf16 %v1030_v22, %v1028_v21  ;;  %v1018_v23 = vpop.f32.mrb[4].mxu0  ;;  %v1984_v21 = vunpack.i.l.bf16 %v1983_v3 }
 0x291   : > { %v1854_v27 = vadd.f32 %v1018_v23, %v877_v24  ;;  %v1020_v33 = vpop.f32.mrb[5].mxu0  ;;  %1099 = vrot.lane.b32.xlu0 %v2568_v20, %s2152_s28  ;;  %v1050_v28 = vsel %vm427_vm8, %v2568_v20, 0  ;;  %v1128_v26 = vsel %vm530_vm11, %v2568_v20, 0  ;;  %v1170_v53 = vsel %vm582_vm14, %v2568_v20, 0 }
 0x292   : > { %v1855_v30 = vadd.f32 %v1020_v33, %v877_v24  ;;  %v1022_v31 = vpop.f32.mrb[6].mxu0  ;;  %1063 = vrot.lane.b32.xlu1 %v1050_v28, %s2151_s26  ;;  %v1051_v39 = vsel %vm428_vm7, %v2570_v17, 0  ;;  %v1129_v51 = vsel %vm531_vm10, %v2570_v17, 0  ;;  %v1171_v36 = vsel %vm583_vm13, %v2570_v17, 0 }
 0x293   : > { %v1856_v32 = vadd.f32 %v1022_v31, %v882_v29  ;;  %v1024_v34 = vpop.f32.mrb[7].mxu0  ;;  %v1031_v40 = vmax.f32 %v1854_v27, 0.0  ;;  %v1220_v57 = vsel %vm641_vm3, %v2570_v17, 0  ;;  %v1339_v62 = vsel %vm777_vm15, %v2568_v20, 0 }
 0x294   : > { %v1857_v37 = vadd.f32 %v1024_v34, %v882_v29  ;;  %v1032_v43 = vmax.f32 %v1855_v30, 0.0  ;;  %v1985_v30 = vunpack.i.h.bf16 %v1983_v3 }
 0x295   : > { %v1033_v42 = vmax.f32 %v1856_v32, 0.0  ;;  %1065 = vrot.lane.b32.xlu0 %v1051_v39, %s2151_s26 }
 0x296   : > { %v1034_v44 = vmax.f32 %v1857_v37, 0.0  ;;  %1101 = vrot.lane.b32.xlu1 %v2570_v17, %s2152_s28 }
 0x297   : > { %v2584_v45 = vpack.c.bf16 %v1033_v42, %v1031_v40 }
 0x298   : > { %v2586_v47 = vpack.c.bf16 %v1034_v44, %v1032_v43 }
 0x299   : > { %v1053_v48 = vsel %vm427_vm8, %v2584_v45, 0  ;;  %v1131_v25 = vsel %vm530_vm11, %v2584_v45, 0  ;;  %v1173_v35 = vsel %vm582_vm14, %v2584_v45, 0  ;;  %vm2951_vm8 = vcmp.ne.s16.totalorder %v2410_v46, 0  ;;  %v2016_v46 = vld [vmem:[%s2920_s3 + $0x4] ss:$12 sps:$4 sm:$0xff]  }
 0x29a   : > { %1069 = vrot.lane.b32.xlu0 %v1053_v48, %s2151_s26  ;;  %v1054_v50 = vsel %vm428_vm7, %v2586_v47, 0  ;;  %v1132_v54 = vsel %vm531_vm10, %v2586_v47, 0  ;;  %v1174_v55 = vsel %vm583_vm13, %v2586_v47, 0  ;;  %vm2949_vm7 = vcmp.ne.s16.totalorder %v2445_v56, 0  ;;  %vm2952_vm10 = vmmov %vm2951_vm8  ;;  %1511 = vmatprep.mubr.bf16.mxu1 %v2016_v46 }
 0x29b   : > { %1071 = vrot.lane.b32.xlu1 %v1054_v50, %s2151_s26  ;;  %v1262_v38 = vsel %vm2949_vm7, %v2570_v17, 0  ;;  %v1219_v41 = vsel %vm2951_vm8, %v2568_v20, 0  ;;  %v1223_v58 = vsel %vm641_vm3, %v2586_v47, 0  ;;  %v1222_v59 = vsel %vm2952_vm10, %v2584_v45, 0  ;;  %vm2956_vm14 = vmmov %vm2949_vm7 }
 0x29c   : > { %vm2953_vm11 = vcmp.ne.s16.totalorder %v2421_v49, 0  ;;  %v1265_v61 = vsel %vm2956_vm14, %v2586_v47, 0  ;;  %v1340_v49 = vsel %vm778_vm4, %v2570_v17, 0  ;;  %v1343_v56 = vsel %vm778_vm4, %v2586_v47, 0 }
 0x29d   : > { %v1261_v60 = vsel %vm2953_vm11, %v2568_v20, 0  ;;  %vm2954_vm13 = vmmov %vm2953_vm11  ;;  %v1342_v63 = vsel %vm777_vm15, %v2584_v45, 0  ;;  %vm2957_vm15 = vcmask 7168  }
 0x29e   : > { %1107 = vrot.lane.b32.xlu0 %v2586_v47, %s2152_s28  ;;  %v1264_v52 = vsel %vm2954_vm13, %v2584_v45, 0 }
 0x29f   : > { %1105 = vrot.lane.b32.xlu1 %v2584_v45, %s2152_s28 }
 0x2a2   : > { %1143 = vrot.lane.b32.xlu0 %v1129_v51, %s2150_s25 }
 0x2a3   : > { %1141 = vrot.lane.b32.xlu1 %v1128_v26, %s2150_s25 }
 0x2a6   : > { %1147 = vrot.lane.b32.xlu0 %v1131_v25, %s2150_s25 }
 0x2a7   : > { %1987 = vrot.lane.b32.xlu1 %v2145_v1, %s2150_s25 }
 0x2aa   : > { %1183 = vrot.lane.b32.xlu0 %v1170_v53, %s2149_s22 }
 0x2ab   : > { %1149 = vrot.lane.b32.xlu1 %v1132_v54, %s2150_s25 }
 0x2ae   : > { %1992 = vrot.lane.b32.xlu0 %v2145_v1, %s2149_s22 }
 0x2af   : > { %1185 = vrot.lane.b32.xlu1 %v1171_v36, %s2149_s22 }
 0x2b2   : > { %1191 = vrot.lane.b32.xlu0 %v1174_v55, %s2149_s22 }
 0x2b3   : > { %1189 = vrot.lane.b32.xlu1 %v1173_v35, %s2149_s22  ;;  %s2955_s22 = smov 112  }
 0x2b6   : > { %1997 = vrot.lane.b32.xlu0 %v2145_v1, %s2948_s23 }
 0x2b7   : > { %1233 = vrot.lane.b32.xlu1 %v1220_v57, %s2948_s23 }
 0x2ba   : > { %1275 = vrot.lane.b32.xlu0 %v1262_v38, %s2950_s27 }
 0x2bb   : > { %1231 = vrot.lane.b32.xlu1 %v1219_v41, %s2948_s23 }
 0x2be   : > { %1239 = vrot.lane.b32.xlu0 %v1223_v58, %s2948_s23 }
 0x2bf   : > { %1237 = vrot.lane.b32.xlu1 %v1222_v59, %s2948_s23  ;;  %s338_s23 = sand.u32 1, %s2132_s10  }
 0x2c0   : > { %s2875_s16 = scalar_lea.sflag [#allocation6], %s338_s23 }
 0x2c2   : > { %1273 = vrot.lane.b32.xlu0 %v1261_v60, %s2950_s27 }
 0x2c3   : > { %2002 = vrot.lane.b32.xlu1 %v2145_v1, %s2950_s27 }
 0x2c6   : > { %1279 = vrot.lane.b32.xlu0 %v1264_v52, %s2950_s27 }
 0x2c7   : > { %1311 = vrot.lane.b32.xlu1 %v2570_v17, %s2955_s22 }
 0x2ca   : > { %1313 = vrot.lane.b32.xlu0 %v2145_v1, %s2955_s22 }
 0x2cb   : > { %1281 = vrot.lane.b32.xlu1 %v1265_v61, %s2950_s27  ;;  %s1820_s27 = sshll.u32 %s338_s23, 6 }
 0x2cc   : > { %s340_s25 = scalar_lea.vmem [#allocation7], %s1820_s27 }
 0x2ce   : > { %1317 = vrot.lane.b32.xlu0 %v2586_v47, %s2955_s22 }
 0x2cf   : > { %1309 = vrot.lane.b32.xlu1 %v2568_v20, %s2955_s22 }
 0x2d2   : > { %1315 = vrot.lane.b32.xlu0 %v2584_v45, %s2955_s22 }
 0x2d3   : > { %1319 = vrot.lane.b32.xlu1 %v2145_v1, %s2955_s22  ;;  %s1849_s22 = sshll.u32 %s2227_s13, 10 }
 0x2d4   : > { %s2865_s24 = scalar_lea.hbm %s2926_s9, %s1849_s22 }
 0x2d6   : > { %1355 = vrot.lane.b32.xlu0 %v2145_v1, %s2146_s21 }
 0x2d7   : > { %1353 = vrot.lane.b32.xlu1 %v1340_v49, %s2146_s21 }
 0x2da   : > { %1359 = vrot.lane.b32.xlu0 %v1343_v56, %s2146_s21 }
 0x2db   : > { %1351 = vrot.lane.b32.xlu1 %v1339_v62, %s2146_s21 }
 0x2de   : > { %1357 = vrot.lane.b32.xlu0 %v1342_v63, %s2146_s21 }
 0x2df   : > { %1361 = vrot.lane.b32.xlu1 %v2145_v1, %s2146_s21  ;;  %s1740_s21 = sshll.u32 %s340_s25, 4  ;;  %s2871_s21 = int_to_ptr.vmem [resolvable:$true] %s1740_s21 }
 0x2e0   : > { %s2074_s29 = scalar_lea.vmem %s2871_s21, 1024 }
 0x2e1   : > { %p2075_p6 = scmp.ne.s32.totalorder %s2871_s21, %s2074_s29 }
 0x2e2   : > { %1430 = vperm.xlu0 %1974, %v1420_v15  }
 0x2e3   : > { %1425 = vperm.xlu1 %1975, %v1419_v0   ;;  %p2076_p10 = pnand %p2075_p6, %p2965_p9 }
 0x2e5   : > { %p2077_p12 = pneg %p2076_p10 }
 0x2e6   : > { %1440 = vperm.xlu0 %1974, %v1422_v14  }
 0x2e7   : > { %1435 = vperm.xlu1 %1975, %v1421_v2  }
 0x303   : > { %v1100_v5 = vpop.permute.xlu0 %1099 }
 0x304   : > { %v1064_v6 = vpop.permute.xlu1 %1063  ;;  %v1109_v33 = vsel %vm490_vm1, %v1984_v21, %v1100_v5 }
 0x305   : > { %v1073_v12 = vsel %vm453_vm5, %v1979_v8, %v1064_v6 }
 0x307   : > { %v1066_v9 = vpop.permute.xlu0 %1065 }
 0x308   : > { %v1102_v10 = vpop.permute.xlu1 %1101  ;;  %v1074_v11 = vsel %vm453_vm5, %v1064_v6, %v1066_v9 }
 0x309   : > { %1479 = vmatprep.subr.bf16.mxu1 %v1074_v11  ;;  %v1110_v23 = vsel %vm490_vm1, %v1100_v5, %v1102_v10 }
 0x30a   : > { %1480 = vmatpush1.bf16.msra.mxu1 %v1073_v12 }
 0x30c   : > { %v1070_v13 = vpop.permute.xlu0 %1069 }
 0x30d   : > { %v1072_v18 = vpop.permute.xlu1 %1071  ;;  %v1075_v22 = vsel %vm453_vm5, %v1980_v16, %v1070_v13 }
 0x30e   : > { %v1076_v19 = vsel %vm453_vm5, %v1070_v13, %v1072_v18 }
 0x30f   : > { %1481 = vmatprep.subr.bf16.mxu1 %v1076_v19 }
 0x310   : > { %v1108_v24 = vpop.permute.xlu0 %1107  ;;  %1482 = vmatpush1.bf16.msra.mxu1 %v1075_v22 }
 0x311   : > { %1483 = vmatprep.subr.bf16.mxu1 %v1110_v23  ;;  %v1106_v27 = vpop.permute.xlu1 %1105 }
 0x312   : > { %v1112_v29 = vsel %vm490_vm1, %v1106_v27, %v1108_v24  ;;  %v1111_v32 = vsel %vm490_vm1, %v1985_v30, %v1106_v27  ;;  %vm2958_vm1 = vmmov %vm2957_vm15  ;;  %v2014_v24 = vld [vmem:[%s2920_s3] ss:$12 sps:$4 sm:$0xff]   ;;  %v2017_v27 = vld [vmem:[%s2920_s3 + $0x1c] ss:$12 sps:$4 sm:$0xff]  }
 0x313   : > { %vm2959_vm3 = vmmov %vm2958_vm1 }
 0x314   : > { %v1144_v28 = vpop.permute.xlu0 %1143  ;;  %1484 = vmatpush1.bf16.msra.mxu1 %v1109_v33  ;;  %vm2960_vm4 = vmmov %vm2958_vm1 }
 0x315   : > { %1485 = vmatprep.subr.bf16.mxu1 %v1112_v29  ;;  %v1142_v31 = vpop.permute.xlu1 %1141 }
 0x316   : > { %v1152_v37 = vsel %vm556_vm2, %v1142_v31, %v1144_v28 }
 0x318   : > { %v1148_v34 = vpop.permute.xlu0 %1147  ;;  %1486 = vmatpush1.bf16.msra.mxu1 %v1111_v32 }
 0x319   : > { %1487 = vmatprep.subr.bf16.mxu1 %v1152_v37  ;;  %v1988_v39 = vpop.permute.xlu1 %1987 }
 0x31a   : > { %v1989_v40 = vunpack.i.l.bf16 %v1988_v39  ;;  %v1990_v42 = vunpack.i.h.bf16 %v1988_v39 }
 0x31c   : > { %v1184_v43 = vpop.permute.xlu0 %1183  ;;  %v1151_v44 = vsel %vm556_vm2, %v1989_v40, %v1142_v31  ;;  %v1153_v26 = vsel %vm556_vm2, %v1990_v42, %v1148_v34  ;;  %v2019_v31 = vld [vmem:[%s2920_s3 + $0x18] ss:$12 sps:$4 sm:$0xff]   ;;  %v2020_v40 = vld [vmem:[%s2920_s3 + $0x8] ss:$12 sps:$4 sm:$0xff]   ;;  %v2021_v42 = vld [vmem:[%s2920_s3 + $0x20] ss:$12 sps:$4 sm:$0xff]  }
 0x31d   : > { %v1150_v48 = vpop.permute.xlu1 %1149  ;;  %1488 = vmatpush1.bf16.msra.mxu1 %v1151_v44 }
 0x31e   : > { %v1154_v50 = vsel %vm556_vm2, %v1148_v34, %v1150_v48 }
 0x31f   : > { %1489 = vmatprep.subr.bf16.mxu1 %v1154_v50 }
 0x320   : > { %v1993_v51 = vpop.permute.xlu0 %1992 }
 0x321   : > { %v1994_v25 = vunpack.i.l.bf16 %v1993_v51  ;;  %v1186_v53 = vpop.permute.xlu1 %1185  ;;  %1490 = vmatpush1.bf16.msra.mxu1 %v1153_v26  ;;  %v1995_v57 = vunpack.i.h.bf16 %v1993_v51 }
 0x322   : > { %v1194_v54 = vsel %vm2957_vm15, %v1184_v43, %v1186_v53 }
 0x323   : > { %1491 = vmatprep.subr.bf16.mxu1 %v1194_v54  ;;  %v1193_v36 = vsel %vm2958_vm1, %v1994_v25, %v1184_v43 }
 0x324   : > { %v1192_v55 = vpop.permute.xlu0 %1191 }
 0x325   : > { %v1190_v35 = vpop.permute.xlu1 %1189  ;;  %1492 = vmatpush1.bf16.msra.mxu1 %v1193_v36 }
 0x326   : > { %v1196_v38 = vsel %vm2959_vm3, %v1190_v35, %v1192_v55  ;;  %v1195_v58 = vsel %vm2960_vm4, %v1995_v57, %v1190_v35 }
 0x327   : > { %1493 = vmatprep.subr.bf16.mxu1 %v1196_v38 }
 0x328   : > { %v1998_v41 = vpop.permute.xlu0 %1997 }
 0x329   : > { %v1234_v59 = vpop.permute.xlu1 %1233  ;;  %1494 = vmatpush1.bf16.msra.mxu1 %v1195_v58  ;;  %v1999_v52 = vunpack.i.l.bf16 %v1998_v41  ;;  %v2000_v62 = vunpack.i.h.bf16 %v1998_v41 }
 0x32a   : > { %1495 = vmatprep.subr.bf16.mxu1 %v2570_v17 }
 0x32b   : > { %v1244_v56 = vsel %vm579_vm12, %v1234_v59, %v1999_v52 }
 0x32c   : > { %v1276_v60 = vpop.permute.xlu0 %1275 }
 0x32d   : > { %v1232_v46 = vpop.permute.xlu1 %1231  ;;  %1496 = vmatpush1.bf16.msra.mxu1 %v2568_v20 }
 0x32e   : > { %1497 = vmatprep.subr.bf16.mxu1 %v2586_v47  ;;  %v1243_v15 = vsel %vm579_vm12, %v1232_v46, %v1234_v59 }
 0x330   : > { %v1240_v61 = vpop.permute.xlu0 %1239 }
 0x331   : > { %v1238_v49 = vpop.permute.xlu1 %1237  ;;  %1498 = vmatpush1.bf16.msra.mxu1 %v2584_v45  ;;  %v1246_v17 = vsel %vm579_vm12, %v1240_v61, %v2000_v62 }
 0x332   : > { %1499 = vmatprep.subr.bf16.mxu1 %v1244_v56  ;;  %v1245_v47 = vsel %vm579_vm12, %v1238_v49, %v1240_v61  ;;  %vm2961_vm12 = vcmask 916480  }
 0x333   : > { %vm2962_vm2 = vmmov %vm2961_vm12 }
 0x334   : > { %v1274_v63 = vpop.permute.xlu0 %1273  ;;  %vm2963_vm5 = vmmov %vm2962_vm2 }
 0x335   : > { %v2003_v0 = vpop.permute.xlu1 %2002  ;;  %1500 = vmatpush1.bf16.msra.mxu1 %v1243_v15  ;;  %v1285_v5 = vsel %vm527_vm9, %v1274_v63, %v1276_v60  ;;  %vm2964_vm7 = vmmov %vm2962_vm2  ;;  %v1602_v63 = vld [vmem:[%s2922_s5 + $0x8] sm:$0xff] }
 0x336   : > { %v2004_v14 = vunpack.i.l.bf16 %v2003_v0  ;;  %1501 = vmatprep.subr.bf16.mxu1 %v1246_v17  ;;  %v2005_v45 = vunpack.i.h.bf16 %v2003_v0 }
 0x338   : > { %v1280_v20 = vpop.permute.xlu0 %1279  ;;  %v1286_v2 = vsel %vm527_vm9, %v1276_v60, %v2004_v14  ;;  %v1601_v14 = vld [vmem:[%s2922_s5] sm:$0xff] }
 0x339   : > { %v1312_v3 = vpop.permute.xlu1 %1311  ;;  %1502 = vmatpush1.bf16.msra.mxu1 %v1245_v47 }
 0x33a   : > { %1503 = vmatprep.subr.bf16.mxu1 %v1286_v2  ;;  %v1603_v2 = vld [vmem:[%s2922_s5 + $0x10] sm:$0xff] }
 0x33c   : > { %v1314_v4 = vpop.permute.xlu0 %1313 }
 0x33d   : > { %v1282_v6 = vpop.permute.xlu1 %1281  ;;  %1504 = vmatpush1.bf16.msra.mxu1 %v1285_v5  ;;  %v1322_v12 = vsel %vm2961_vm12, %v1312_v3, %v1314_v4  ;;  %v1604_v5 = vld [vmem:[%s2922_s5 + $0x18] sm:$0xff] }
 0x33e   : > { %v1288_v8 = vsel %vm527_vm9, %v1282_v6, %v2005_v45  ;;  %v1287_v10 = vsel %vm527_vm9, %v1280_v20, %v1282_v6 }
 0x33f   : > { %1505 = vmatprep.subr.bf16.mxu1 %v1288_v8 }
 0x340   : > { %v1318_v9 = vpop.permute.xlu0 %1317 }
 0x341   : > { %v1310_v11 = vpop.permute.xlu1 %1309  ;;  %1506 = vmatpush1.bf16.msra.mxu1 %v1287_v10 }
 0x342   : > { %1507 = vmatprep.subr.bf16.mxu1 %v1322_v12  ;;  %v1321_v16 = vsel %vm2962_vm2, %v1310_v11, %v1312_v3 }
 0x344   : > { %v1316_v13 = vpop.permute.xlu0 %1315 }
 0x345   : > { %v1320_v18 = vpop.permute.xlu1 %1319  ;;  %1508 = vmatpush1.bf16.msra.mxu1 %v1321_v16  ;;  %v1323_v22 = vsel %vm2964_vm7, %v1316_v13, %v1318_v9 }
 0x346   : > { %v1324_v19 = vsel %vm2963_vm5, %v1318_v9, %v1320_v18 }
 0x347   : > { %1509 = vmatprep.subr.bf16.mxu1 %v1324_v19 }
 0x348   : > { %v1356_v21 = vpop.permute.xlu0 %1355 }
 0x349   : > { %v1354_v23 = vpop.permute.xlu1 %1353  ;;  %1510 = vmatpush1.bf16.msra.mxu1 %v1323_v22 }
 0x34a   : > { %v1364_v33 = vsel %vm424_vm6, %v1354_v23, %v1356_v21 }
 0x34b   : > { %1532 = vmatprep.subr.bf16.mxu1 %v1364_v33  ;;  %v1623_v33 = vld [vmem:[%s2923_s6] sm:$0x1] }
 0x34c   : > { %v1360_v28 = vpop.permute.xlu0 %1359  ;;  %1512 = vmatmul.mubr.bf16.vlgmr.msra.gmra.mrb[0].mxu1 %v2014_v24 }
 0x34d   : > { %v1352_v29 = vpop.permute.xlu1 %1351  ;;  %1521 = vmatprep.mubr.bf16.mxu1 %v2017_v27 }
 0x34e   : > { %v1363_v30 = vsel %vm424_vm6, %v1352_v29, %v1354_v23 }
 0x34f   : > { %1533 = vmatpush1.bf16.msra.mxu1 %v1363_v30 }
 0x350   : > { %v1358_v32 = vpop.permute.xlu0 %1357 }
 0x351   : > { %v1362_v34 = vpop.permute.xlu1 %1361  ;;  %v1365_v39 = vsel %vm424_vm6, %v1358_v32, %v1360_v28  ;;  %v1626_v32 = vld [vmem:[%s2924_s7] sm:$0xff] }
 0x352   : > { %v1366_v37 = vsel %vm424_vm6, %v1360_v28, %v1362_v34  ;;  %vm1609_vm6 = vcmask 15360  }
 0x353   : > { %1534 = vmatprep.subr.bf16.mxu1 %v1366_v37  ;;  %v1629_v37 = vld [vmem:[%s2924_s7 + $0x18] sm:$0xff] }
 0x354   : > { %1522 = vmatmul.mubr.bf16.gmra.mrb[4].mxu1 %v2019_v31  ;;  %v1627_v31 = vld [vmem:[%s2924_s7 + $0x8] sm:$0xff] }
 0x355   : > { %1535 = vmatpush1.bf16.msra.mxu1 %v1365_v39  ;;  %1564 = vmatprep.mubr.bf16.mxu1 %v2145_v1  ;;  %v1628_v39 = vld [vmem:[%s2924_s7 + $0x10] sm:$0xff] }
 0x35c   : > { %1837 = vmatmul.mubr.msk.bf16.vlgmr.msra.gmra.mrb[0].mxu1 %vm914_vm0, %v2020_v40 }
 0x35d   : > { %1574 = vmatprep.mubr.bf16.mxu1 %v2145_v1 }
 0x361   : > { %v1431_v51 = vpop.permute.xlu0 %1430 }
 0x362   : > { %v1426_v43 = vpop.permute.xlu1 %1425 }
 0x364   : > { %1838 = vmatmul.mubr.msk.bf16.gmra.mrb[4].mxu1 %vm914_vm0, %v2021_v42 }
 0x365   : > { %v1441_v58 = vpop.permute.xlu0 %1440 }
 0x366   : > { %v1436_v35 = vpop.permute.xlu1 %1435 }
 0x42f   : > { %v1566_v44 = vpop.f32.mrb[0].mxu1 }
 0x430   : > { %v2774_v48 = vadd.f32 %v1566_v44, %v1426_v43  ;;  %v1568_v50 = vpop.f32.mrb[1].mxu1 }
 0x431   : > { %v2776_v26 = vadd.f32 %v1568_v50, %v1426_v43  ;;  %v1570_v25 = vpop.f32.mrb[2].mxu1 }
 0x432   : > { %v2778_v53 = vadd.f32 %v1570_v25, %v1431_v51  ;;  %v1572_v54 = vpop.f32.mrb[3].mxu1 }
 0x433   : > { %v1585_v1 = vadd.f32 %v2776_v26, %v2774_v48  ;;  %v2782_v36 = vadd.f32 %v1572_v54, %v1431_v51  ;;  %v1651_v54 = vld [vmem:[%s2925_s8 + $0x8] sm:$0xff] }
 0x435   : > { %v1588_v55 = vadd.f32 %v2782_v36, %v2778_v53  ;;  %1586 = vadd.xlane.f32.xlu1 %v1585_v1  ;;  %v1650_v1 = vld [vmem:[%s2925_s8] sm:$0xff] }
 0x437   : > { %v1576_v57 = vpop.f32.mrb[4].mxu1  ;;  %1589 = vadd.xlane.f32.xlu0 %v1588_v55 }
 0x438   : > { %v2786_v38 = vadd.f32 %v1576_v57, %v1436_v35  ;;  %v1578_v41 = vpop.f32.mrb[5].mxu1 }
 0x439   : > { %v2788_v59 = vadd.f32 %v1578_v41, %v1436_v35  ;;  %v1580_v60 = vpop.f32.mrb[6].mxu1 }
 0x43a   : > { %v2790_v52 = vadd.f32 %v1580_v60, %v1441_v58  ;;  %v1582_v46 = vpop.f32.mrb[7].mxu1  ;;  %v1652_v60 = vld [vmem:[%s2925_s8 + $0x10] sm:$0xff] }
 0x43b   : > { %v1591_v61 = vadd.f32 %v2788_v59, %v2786_v38  ;;  %v2794_v49 = vadd.f32 %v1582_v46, %v1441_v58  ;;  %v1653_v58 = vld [vmem:[%s2925_s8 + $0x18] sm:$0xff] }
 0x43d   : > { %v1594_v56 = vadd.f32 %v2794_v49, %v2790_v52  ;;  %1592 = vadd.xlane.f32.xlu0 %v1591_v61 }
 0x43f   : > { %1595 = vadd.xlane.f32.xlu1 %v1594_v56 }
 0x4c2   : > { %v1587_v62 = vpop.xlane.xlu1 %1586 }
 0x4c3   : > { %v1597_v0 = vmul.f32 0.00390625, %v1587_v62 }
 0x4c4   : > { %v1590_v15 = vpop.xlane.xlu0 %1589 }
 0x4c5   : > { %v1598_v17 = vmul.f32 0.00390625, %v1590_v15  ;;  %v1605_v47 = vmul.f32 %v1601_v14, %v1597_v0 }
 0x4c7   : > { %v1606_v20 = vmul.f32 %v1602_v63, %v1598_v17  ;;  %v1610_v8 = vsel %vm1609_vm6, %v1605_v47, 0.0 }
 0x4c9   : > { %v1611_v45 = vsel %vm1609_vm6, %v1606_v20, 0.0 }
 0x4ca   : > { %v1593_v3 = vpop.xlane.xlu0 %1592  ;;  %v1612_v11 = vadd.f32 %v1611_v45, %v1610_v8 }
 0x4cb   : > { %v1599_v4 = vmul.f32 0.00390625, %v1593_v3 }
 0x4cc   : > { %v1596_v6 = vpop.xlane.xlu1 %1595 }
 0x4cd   : > { %v1607_v9 = vmul.f32 %v1603_v2, %v1599_v4  ;;  %v1600_v10 = vmul.f32 0.00390625, %v1596_v6 }
 0x4cf   : > { %v1613_v12 = vsel %vm1609_vm6, %v1607_v9, 0.0  ;;  %v1608_v13 = vmul.f32 %v1604_v5, %v1600_v10 }
 0x4d0   : > { %v1614_v16 = vadd.f32 %v1613_v12, %v1612_v11 }
 0x4d1   : > { %v1615_v18 = vsel %vm1609_vm6, %v1608_v13, 0.0 }
 0x4d2   : > { %v1616_v19 = vadd.f32 %v1615_v18, %v1614_v16 }
 0x4d4   : > { %v1617_v21 = vrot.slane %v1616_v19, 4 }
 0x4d6   : > { %v1618_v22 = vadd.f32 %v1617_v21, %v1616_v19  ;;  %v2038_v21 = vld [vmem:[%s2308_s17 + $0x10] sm:$0xff] }
 0x4d8   : > { %v1619_v24 = vrot.slane %v1618_v22, 2 }
 0x4da   : > { %v1620_v23 = vadd.f32 %v1619_v24, %v1618_v22  ;;  %v2039_v24 = vld [vmem:[%s2308_s17 + $0x18] sm:$0xff] }
 0x4dc   : > { %v1621_v27 = vrot.slane %v1620_v23, 1 }
 0x4de   : > { %v1622_v28 = vadd.f32 %v1621_v27, %v1620_v23  ;;  %v2040_v27 = vld [vmem:[%s2308_s17] sm:$0xff] }
 0x4e0   : > { %v1624_v29 = vadd.f32 %v1623_v33, %v1622_v28  ;;  %v2041_v28 = vld [vmem:[%s2308_s17 + $0x8] sm:$0xff] }
 0x4e2   : > { %v1625_v30 = vmax.f32 %v1624_v29, 0.0 }
 0x4e4   : > { %v1633_v34 = vrot.slane %v1625_v30, %v2291_v7 }
 0x4e6   : > { %v1635_v40 = vmul.f32 %v1633_v34, %v1627_v31  ;;  %v1634_v42 = vmul.f32 %v1633_v34, %v1626_v32  ;;  %v1637_v50 = vmul.f32 %v1633_v34, %v1629_v37  ;;  %v1636_v51 = vmul.f32 %v1633_v34, %v1628_v39  ;;  %v2042_v32 = vld [vmem:[%s2308_s17 + $0x20] sm:$0xff]  ;;  %v2043_v37 = vld [vmem:[%s2308_s17 + $0x28] sm:$0xff] }
 0x4e8   : > { %v1641_v43 = vsel %vm1609_vm6, %v1635_v40, 0.0  ;;  %v1638_v44 = vsel %vm1609_vm6, %v1634_v42, 0.0  ;;  %v1647_v7 = vsel %vm1609_vm6, %v1637_v50, 0.0  ;;  %v1644_v25 = vsel %vm1609_vm6, %v1636_v51, 0.0  ;;  %v2044_v40 = vld [vmem:[%s2308_s17 + $0x30] sm:$0xff] }
 0x4e9   : > { %1642 = vadd.xlane.f32.xlu1 %v1641_v43  ;;  %1639 = vadd.xlane.f32.xlu0 %v1638_v44 }
 0x4ed   : > { %1648 = vadd.xlane.f32.xlu1 %v1647_v7  ;;  %1645 = vadd.xlane.f32.xlu0 %v1644_v25 }
 0x576   : > { %v1643_v55 = vpop.xlane.xlu1 %1642  ;;  %v1640_v35 = vpop.xlane.xlu0 %1639 }
 0x577   : > { %v1655_v57 = vadd.f32 %v1651_v54, %v1643_v55  ;;  %v1654_v41 = vadd.f32 %v1650_v1, %v1640_v35 }
 0x579   : > { %v1840_v46 = vmul.f32 -1.442695, %v1655_v57  ;;  %v1839_v61 = vmul.f32 -1.442695, %v1654_v41 }
 0x57a   : > { %v1649_v56 = vpop.xlane.xlu1 %1648  ;;  %v1646_v62 = vpop.xlane.xlu0 %1645 }
 0x57b   : > { %2022 = vpow2.f32 %v1840_v46  ;;  %v1657_v63 = vadd.f32 %v1653_v58, %v1649_v56  ;;  %v1656_v15 = vadd.f32 %v1652_v60, %v1646_v62 }
 0x57c   : > { %2024 = vpow2.f32 %v1839_v61 }
 0x57d   : > { %v1842_v0 = vmul.f32 -1.442695, %v1657_v63  ;;  %v1841_v17 = vmul.f32 -1.442695, %v1656_v15 }
 0x57f   : > { %2026 = vpow2.f32 %v1842_v0 }
 0x580   : > { %2028 = vpow2.f32 %v1841_v17 }
 0x585   : > { %v2023_v14 = vpop.eup %2022 }
 0x586   : > { %v2025_v20 = vpop.eup %2024  ;;  %v1671_v47 = vadd.f32 1.0, %v2023_v14 }
 0x587   : > { %v1670_v2 = vadd.f32 1.0, %v2025_v20 }
 0x588   : > { %2030 = vrcp.f32 %v1671_v47 }
 0x589   : > { %v2027_v3 = vpop.eup %2026  ;;  %2032 = vrcp.f32 %v1670_v2 }
 0x58a   : > { %v2029_v45 = vpop.eup %2028  ;;  %v1673_v4 = vadd.f32 1.0, %v2027_v3 }
 0x58b   : > { %v1672_v5 = vadd.f32 1.0, %v2029_v45 }
 0x58c   : > { %2034 = vrcp.f32 %v1673_v4 }
 0x58d   : > { %2036 = vrcp.f32 %v1672_v5 }
 0x592   : > { %v2031_v6 = vpop.eup %2030 }
 0x593   : > { %v2033_v8 = vpop.eup %2032  ;;  %1689 = vperm.xlu1 %1975, %v2031_v6  }
 0x594   : > { %1684 = vperm.xlu0 %1974, %v2033_v8  }
 0x596   : > { %v2035_v9 = vpop.eup %2034 }
 0x597   : > { %v2037_v10 = vpop.eup %2036 }
 0x598   : > { %1699 = vperm.xlu0 %1974, %v2035_v9   ;;  %1694 = vperm.xlu1 %1975, %v2037_v10  }
 0x612   : > { %v1690_v11 = vpop.permute.xlu1 %1689 }
 0x613   : > { %v1704_v12 = vmul.f32 %v2778_v53, %v1690_v11  ;;  %v1705_v13 = vmul.f32 %v2782_v36, %v1690_v11  ;;  %v1685_v16 = vpop.permute.xlu0 %1684 }
 0x614   : > { %v1702_v18 = vmul.f32 %v2774_v48, %v1685_v16  ;;  %v1703_v19 = vmul.f32 %v2776_v26, %v1685_v16 }
 0x615   : > { %v1712_v22 = vadd.f32 %v2038_v21, %v1704_v12  ;;  %v1713_v23 = vadd.f32 %v2039_v24, %v1705_v13 }
 0x616   : > { %v1710_v33 = vadd.f32 %v2040_v27, %v1702_v18  ;;  %v1711_v29 = vadd.f32 %v2041_v28, %v1703_v19 }
 0x617   : > { %1720 = vst [vmem:[%s340_s25 + $0x10] sm:$0xff] %v1712_v22  ;;  %1721 = vst [vmem:[%s340_s25 + $0x18] sm:$0xff] %v1713_v23  ;;  %v1695_v53 = vpop.permute.xlu1 %1694  ;;  %v1700_v48 = vpop.permute.xlu0 %1699 }
 0x618   : > { %1718 = vst [vmem:[%s340_s25] sm:$0xff] %v1710_v33  ;;  %1719 = vst [vmem:[%s340_s25 + $0x8] sm:$0xff] %v1711_v29  ;;  %v1706_v26 = vmul.f32 %v2786_v38, %v1695_v53  ;;  %v1707_v36 = vmul.f32 %v2788_v59, %v1695_v53  ;;  %v1708_v30 = vmul.f32 %v2790_v52, %v1700_v48  ;;  %v2045_v38 = vld [vmem:[%s2308_s17 + $0x38] sm:$0xff]  ;;  %s2078_s17 = sshll.u32 %s2154_s14, 4  ;;  %s2079_s17 = int_to_ptr.vmem [resolvable:$false] %s2078_s17 }
 0x619   : > { %v1709_v31 = vmul.f32 %v2794_v49, %v1700_v48  ;;  %s2080_s27 = scalar_lea.vmem %s2079_s17, 2048  ;;  %p2081_p2 = scmp.lt.s32.totalorder %s2871_s21, %s2079_s17 }
 0x61a   : > { %v1714_v34 = vadd.f32 %v2042_v32, %v1706_v26  ;;  %v1715_v39 = vadd.f32 %v2043_v37, %v1707_v36  ;;  %v1716_v42 = vadd.f32 %v2044_v40, %v1708_v30  ;;  %p2082_p3 = scmp.lt.s32.totalorder %s2080_s27, %s2074_s29 }
 0x61b   : > { %v1717_v43 = vadd.f32 %v2045_v38, %v1709_v31 }
 0x61c   : > { %1722 = vst [vmem:[%s340_s25 + $0x20] sm:$0xff] %v1714_v34  ;;  %1723 = vst [vmem:[%s340_s25 + $0x28] sm:$0xff] %v1715_v39  ;;  %p2083_p4 = por %p2082_p3, %p2081_p2 }
 0x61d   : > { %1724 = vst [vmem:[%s340_s25 + $0x30] sm:$0xff] %v1716_v42  ;;  %1725 = vst [vmem:[%s340_s25 + $0x38] sm:$0xff] %v1717_v43 }
 0x61e   : > { %p2084_p7 = pnand %p2083_p4, %p2077_p12 }
 0x620   : > { %2087 = shalt.err (!%p2084_p7)
}
 0x621   : > { %s2088_s23 = scalar_lea.hbm %s2865_s24, 1024  ;;  %s2092_s13 = scalar_lea.hbm %s2926_s9, 2048 }
 0x622   : > { %p2089_p8 = scmp.ne.s32.totalorder %s2865_s24, %s2088_s23  ;;  %p2093_p0 = scmp.lt.u32.totalorder %s2865_s24, %s2926_s9 }
 0x623   : > { %p2094_p1 = scmp.lt.u32.totalorder %s2092_s13, %s2088_s23  ;;  %p2096_p6 = scmp.lt.u32.totalorder %s2088_s23, %s2865_s24 }
 0x624   : > { %p2090_p11 = pnand %p2089_p8, %p2965_p9 }
 0x625   : > { %p2095_p5 = por %p2094_p1, %p2093_p0 }
 0x626   : > { %p2091_p13 = pneg %p2090_p11 }
 0x627   : > { %p2097_p10 = por %p2096_p6, %p2095_p5 }
 0x629   : > { %p2098_p12 = pnand %p2097_p10, %p2091_p13 }
 0x62b   : > { %2101 = shalt.err (!%p2098_p12)
}
 0x62c   : > { %s2155_s29 = smov 256  }
 0x62d   : > { %1886 = dma.vmem_to_hbm [thread:$0]  (%p2965_p9), %s2871_s21, 1024, %s2865_s24, %s2875_s16, %s2155_s29, %s2155_s29, %s2152_s28  }
 0x62e PF: > { %p1898_p2 = scmp.ge.s32.totalorder %s2140_s12, 2  ;;  %s1755_s17 = sand.u32 1, %s2128_s30  }
 0x62f   : > { %p2966_p3 = scmp.ne.s32.totalorder %s2942_s20, 0  ;;  %s1756_s27 = scalar_lea.sflag [#allocation6], %s1755_s17 }
 0x631   : > { %p1893_p4 = pnand %p1898_p2, %p2966_p3 }
 0x633   : > { %2123 = dma.done.wait (!%p1893_p4), %s1756_s27, 1024  }
 0x634   : > { %2125 = vsyncadd (!%p1893_p4), %s1756_s27, 4294966272  ;;  %p20_p7 = scmp.ge.s32.totalorder %s2231_s15, 4   ;;  %s2967_s30 = smov %s2132_s10 }
 0x635   : > { %s2968_s10 = smov %s2136_s11  ;;  %s2969_s11 = smov %s2242_s18 }
 0x636   : > { %s2970_s12 = smov %s2231_s15  ;;  %22 = sbr.rel (!%p20_p7) target bundleno = 4 (0x4), region = 96 }
 0x63d   :  { %1761 = vsyncpa [#allocation5], 1 }
 0x63e   :  { %1763 = vsyncpa [#allocation5 + $0x1], 1 }
 0x63f   :  { %1764 = vsyncpa [#allocation6], 1 }
 0x640   :  { %1766 = vsyncpa [#allocation6 + $0x1], 1 }

</bundles_post_ra>
